<compile_context>
chip_gen: v6e
topology: v6e:2x2x1
jax: 0.10.0
libtpu: 0.0.40
codegen_flags: <defaults>
</compile_context>

<pallas_src>
import numpy as np
import jax
import jax.numpy as jnp
from jax.experimental import pallas as pl
from jax.experimental.pallas import tpu as pltpu

LANE = 128  # lane-dense padded feature width


# ----------------------- beta schedule (setup glue) ------------------------
def vp_beta_schedule(timesteps):
    t = np.arange(1, timesteps + 1)
    T = timesteps
    b_max, b_min = 10.0, 0.1
    alpha = np.exp(-b_min / T - 0.5 * (b_max - b_min) * (2 * t - 1) / T ** 2)
    return 1.0 - alpha


# ---------------- Pallas kernel: fully fused DDIM reverse loop -------------
def _make_ddim_kernel(n_steps, use_noise, state_dim, action_dim):
    """Single invocation; all n_steps DDIM steps unrolled in the body."""
    S, A, F = state_dim, action_dim, LANE

    def kernel(*refs):
        if use_noise:
            (scal_ref, temb_ref, x_ref, act_ref, st_ref,
             w1a_ref, w1s_ref, w1x_ref, w2_ref, b2_ref, w3_ref, b3_ref,
             noise_ref, out_ref, pad_x, pad_a, pad_s) = refs
        else:
            (scal_ref, temb_ref, x_ref, act_ref, st_ref,
             w1a_ref, w1s_ref, w1x_ref, w2_ref, b2_ref, w3_ref, b3_ref,
             out_ref, pad_x, pad_a, pad_s) = refs

        # ---- one-time prologue: in-kernel zero padding to 128 lanes -------
        pad_a[...] = jnp.zeros_like(pad_a)
        pad_a[:, 0:A] = act_ref[...]
        pad_s[...] = jnp.zeros_like(pad_s)
        pad_s[:, 0:S] = st_ref[...]
        pad_x[...] = jnp.zeros_like(pad_x)
        pad_x[:, 0:S] = x_ref[...]

        # Step-invariant part of MLP layer 1 (action / state; b1 is folded
        # into the per-step temb rows on the host).  f32 accumulation.
        cond = (jnp.dot(pad_a[...].astype(jnp.bfloat16), w1a_ref[...],
                        preferred_element_type=jnp.float32)
                + jnp.dot(pad_s[...].astype(jnp.bfloat16), w1s_ref[...],
                          preferred_element_type=jnp.float32))

        x = pad_x[...]                     # (B, F) f32 carried state
        w1x = w1x_ref[...]                 # bf16 weights, resident in VMEM
        w2 = w2_ref[...]
        w3 = w3_ref[...]
        b2 = b2_ref[...]
        b3 = b3_ref[...]

        # ---- fully unrolled DDIM reverse loop (n_steps <= 10) -------------
        for r in range(n_steps):
            c1 = scal_ref[4 * r + 0]       # SMEM scalar -> splat
            c2 = scal_ref[4 * r + 1]
            trow = temb_ref[r:r + 1, :]    # (1, F) per-step temb projection

            # Synthetic denoiser: eps = MLP(concat[x, temb, action, state]).
            h = jnp.dot(x.astype(jnp.bfloat16), w1x,
                        preferred_element_type=jnp.float32)
            h = jnp.maximum(h + cond + trow, 0.0)
            h = jnp.dot(h.astype(jnp.bfloat16), w2,
                        preferred_element_type=jnp.float32) + b2
            h = jnp.maximum(h, 0.0)
            eps = jnp.dot(h.astype(jnp.bfloat16), w3,
                          preferred_element_type=jnp.float32) + b3

            # DDIM update (matches the reference p_sample), kept in f32.
            x = c1 * x - c2 * eps
            if use_noise:
                sigma = scal_ref[4 * r + 2]
                x = x + sigma * noise_ref[r]

        out_ref[...] = x

    return kernel


# --------------------------- module wrapper --------------------------------
class DiffusionDDIM:
    """JAX/Pallas port of Diffusion.forward with a synthetic MLP denoiser."""

    def __init__(self, state_dim, action_dim, hidden_dim=64, temb_dim=16,
                 n_timesteps=20, eta=0.0, seed=0):
        self.state_dim = state_dim
        self.action_dim = action_dim
        self.hidden_dim = hidden_dim
        self.temb_dim = temb_dim
        self.n_timesteps = int(n_timesteps)
        self.eta = float(eta)

        betas = vp_beta_schedule(n_timesteps).astype(np.float64)
        alphas = 1.0 - betas
        self.betas = betas
        self.alphas_cumprod = np.cumprod(alphas)
        self.alphas_cumprod_prev = np.concatenate([[1.0], self.alphas_cumprod[:-1]])

        self.ddim_timesteps = 10
        self.c = self.n_timesteps // self.ddim_timesteps
        self.ddim_timesteps_list = np.arange(0, self.n_timesteps, self.c) + 1

        # Deterministic synthetic denoiser weights.
        key = jax.random.PRNGKey(seed)
        ks = jax.random.split(key, 8)

        def init(k, shape, fan_in):
            return np.asarray(
                jax.random.normal(k, shape, dtype=jnp.float32)) / np.sqrt(float(fan_in))

        H, S, A, T = hidden_dim, state_dim, action_dim, temb_dim
        self.w1x = init(ks[0], (S, H), S)
        self.w1a = init(ks[1], (A, H), A)
        self.w1s = init(ks[2], (S, H), S)
        self.w1t = init(ks[3], (T, H), T)
        self.b1 = np.zeros((1, H), np.float32)
        self.w2 = init(ks[4], (H, H), H)
        self.b2 = np.zeros((1, H), np.float32)
        self.w3 = init(ks[5], (H, S), H)
        self.b3 = np.zeros((1, S), np.float32)
        self.noise_key = ks[6]

        # Lane-dense (128-padded) weights.  Zero-lane preservation invariant:
        # padded rows/cols of every weight and padded lanes of every bias MUST
        # stay exactly zero (ReLU keeps zeros), otherwise garbage would leak
        # into out[:, :S] via w3's padded rows.
        F = LANE
        w1a_p = np.zeros((F, F), np.float32); w1a_p[:A, :H] = self.w1a
        w1s_p = np.zeros((F, F), np.float32); w1s_p[:S, :H] = self.w1s
        w1x_p = np.zeros((F, F), np.float32); w1x_p[:S, :H] = self.w1x
        w2_p = np.zeros((F, F), np.float32); w2_p[:H, :H] = self.w2
        w3_p = np.zeros((F, F), np.float32); w3_p[:H, :S] = self.w3
        b2_p = np.zeros((1, F), np.float32); b2_p[:, :H] = self.b2
        b3_p = np.zeros((1, F), np.float32); b3_p[:, :S] = self.b3
        assert not b2_p[:, H:].any() and not b3_p[:, S:].any()

        # bf16 MXU operands (f32 accumulation inside the kernel).
        self.w1a_p = jnp.asarray(w1a_p, dtype=jnp.bfloat16)
        self.w1s_p = jnp.asarray(w1s_p, dtype=jnp.bfloat16)
        self.w1x_p = jnp.asarray(w1x_p, dtype=jnp.bfloat16)
        self.w2_p = jnp.asarray(w2_p, dtype=jnp.bfloat16)
        self.w3_p = jnp.asarray(w3_p, dtype=jnp.bfloat16)
        self.b2_p = jnp.asarray(b2_p)   # f32
        self.b3_p = jnp.asarray(b3_p)   # f32

        self._step_tab_cache = {}
        self._sampler_cache = {}

    # sinusoidal time embedding (host-side glue, computed once per schedule)
    def _time_emb_np(self, t):
        half = self.temb_dim // 2
        freqs = np.exp(-np.log(10000.0) * np.arange(half) / half)
        ang = float(t) * freqs
        return np.concatenate([np.sin(ang), np.cos(ang)]).astype(np.float32)

    # Per-step tables, ordered by execution order (reversed timestep list):
    #   scal (n_used*4,) f32 SMEM : [c1, c2, sigma, 0] per step
    #   temb (n_used, LANE) f32 VMEM : temb(t) @ w1t + b1 (padded with zeros)
    def _step_tables(self, n_used):
        if n_used in self._step_tab_cache:
            return self._step_tab_cache[n_used]
        H = self.hidden_dim
        scal = np.zeros((n_used, 4), np.float32)
        temb = np.zeros((n_used, LANE), np.float32)
        for row, i in enumerate(reversed(range(n_used))):
            t = int(self.ddim_timesteps_list[i])
            abar = float(self.alphas_cumprod[t])
            abar_prev = float(self.alphas_cumprod_prev[t])
            beta_t = float(self.betas[t])
            scal[row, 0] = np.sqrt(abar_prev / abar)
            scal[row, 1] = np.sqrt(abar_prev * (1.0 - abar) / abar)
            scal[row, 2] = self.eta * (1.0 - abar_prev) / (1.0 - abar) * beta_t
            temb[row, :H] = self._time_emb_np(t) @ self.w1t + self.b1[0]
        tabs = (jnp.asarray(scal.reshape(-1)), jnp.asarray(temb))
        self._step_tab_cache[n_used] = tabs
        return tabs

    # jitted fused sampler, cached per (n_steps, batch, use_noise)
    def _get_sampler(self, n_used, batch, use_noise):
        cache_key = (n_used, batch, use_noise)
        if cache_key in self._sampler_cache:
            return self._sampler_cache[cache_key]

        F, S = LANE, self.state_dim
        kernel = _make_ddim_kernel(n_used, use_noise, self.state_dim,
                                   self.action_dim)

        vmem = pl.BlockSpec(memory_space=pltpu.MemorySpace.VMEM)
        smem = pl.BlockSpec(memory_space=pltpu.MemorySpace.SMEM)
        in_specs = [smem] + [vmem] * 11          # scal + (temb,x,a,s,5 w,2 b)
        if use_noise:
            in_specs.append(vmem)                # resident noise table

        fused = pl.pallas_call(
            kernel,
            out_shape=jax.ShapeDtypeStruct((batch, F), jnp.float32),
            in_specs=in_specs,
            out_specs=pl.BlockSpec(memory_space=pltpu.MemorySpace.VMEM),
            scratch_shapes=[pltpu.VMEM((batch, F), jnp.float32),   # pad_x
                            pltpu.VMEM((batch, F), jnp.float32),   # pad_a
                            pltpu.VMEM((batch, F), jnp.float32)],  # pad_s
        )

        w1a_p, w1s_p, w1x_p = self.w1a_p, self.w1s_p, self.w1x_p
        w2_p, b2_p, w3_p, b3_p = self.w2_p, self.b2_p, self.w3_p, self.b3_p

        def sample(x, action, state, scal_tab, temb_tab, *maybe_key):
            args = [scal_tab, temb_tab, x, action, state,
                    w1a_p, w1s_p, w1x_p, w2_p, b2_p, w3_p, b3_p]
            if use_noise:
                # TODO(synk): generate in-kernel via pltpu.prng_seed /
                # pltpu.prng_random_bits (Box-Muller) instead.
                noise = jax.random.normal(maybe_key[0], (n_used, batch, F),
                                          dtype=jnp.float32)
                args.append(noise)
            out = fused(*args)
            return out[:, :S]

        jitted = jax.jit(sample)
        self._sampler_cache[cache_key] = jitted
        return jitted

    # mirrors Diffusion.forward -> predict -> p_sample_loop
    def forward(self, noised_next_state, action, state, tstp):
        x = jnp.asarray(noised_next_state, jnp.float32)
        action = jnp.asarray(action, jnp.float32)
        state = jnp.asarray(state, jnp.float32)

        squeeze = x.ndim == 1
        if squeeze:
            x, action, state = x[None, :], action[None, :], state[None, :]
        B = x.shape[0]

        n_used = int(tstp) // self.c
        if n_used <= 0:
            return x[0] if squeeze else x

        use_noise = self.eta != 0.0
        scal_tab, temb_tab = self._step_tables(n_used)
        sampler = self._get_sampler(n_used, B, use_noise)

        if use_noise:
            self.noise_key, sub = jax.random.split(self.noise_key)
            out = sampler(x, action, state, scal_tab, temb_tab, sub)
        else:
            out = sampler(x, action, state, scal_tab, temb_tab)

        return out[0] if squeeze else out

    __call__ = forward


if __name__ == "__main__":
    B, STATE_DIM, ACTION_DIM = 2, 16, 8
    N_TIMESTEPS = 20

    diff = DiffusionDDIM(state_dim=STATE_DIM, action_dim=ACTION_DIM,
                         hidden_dim=64, temb_dim=16,
                         n_timesteps=N_TIMESTEPS, eta=0.0, seed=0)

    key = jax.random.PRNGKey(0)
    k1, k2, k3 = jax.random.split(key, 3)
    noised_next_state = jax.random.normal(k1, (B, STATE_DIM), dtype=jnp.float32)
    action = jax.random.normal(k2, (B, ACTION_DIM), dtype=jnp.float32)
    state = jax.random.normal(k3, (B, STATE_DIM), dtype=jnp.float32)

    out = diff(noised_next_state, action, state, N_TIMESTEPS)
    out = jax.block_until_ready(out)
    assert out.shape == (B, STATE_DIM) and out.dtype == jnp.float32
    assert bool(jnp.all(jnp.isfinite(out)))

    # Also exercise the stochastic (eta != 0) branch of the fused kernel.
    diff_eta = DiffusionDDIM(state_dim=STATE_DIM, action_dim=ACTION_DIM,
                             hidden_dim=64, temb_dim=16,
                             n_timesteps=N_TIMESTEPS, eta=0.5, seed=0)
    out2 = jax.block_until_ready(
        diff_eta(noised_next_state, action, state, N_TIMESTEPS))
    assert out2.shape == (B, STATE_DIM)
    assert bool(jnp.all(jnp.isfinite(out2)))

    print("KERNEL_OK")
</pallas_src>

<mosaic_0001>
module attributes {stable_mosaic.version = 11 : i64} {
  func.func @kernel(%arg0: memref<40xf32, #tpu.memory_space<smem>>, %arg1: memref<10x128xf32, #tpu.memory_space<vmem>>, %arg2: memref<2x16xf32, #tpu.memory_space<vmem>>, %arg3: memref<2x8xf32, #tpu.memory_space<vmem>>, %arg4: memref<2x16xf32, #tpu.memory_space<vmem>>, %arg5: memref<128x128xbf16, #tpu.memory_space<vmem>>, %arg6: memref<128x128xbf16, #tpu.memory_space<vmem>>, %arg7: memref<128x128xbf16, #tpu.memory_space<vmem>>, %arg8: memref<128x128xbf16, #tpu.memory_space<vmem>>, %arg9: memref<1x128xf32, #tpu.memory_space<vmem>>, %arg10: memref<128x128xbf16, #tpu.memory_space<vmem>>, %arg11: memref<1x128xf32, #tpu.memory_space<vmem>>, %arg12: memref<2x128xf32, #tpu.memory_space<vmem>>, %arg13: memref<2x128xf32, #tpu.memory_space<vmem>>, %arg14: memref<2x128xf32, #tpu.memory_space<vmem>>, %arg15: memref<2x128xf32, #tpu.memory_space<vmem>>) attributes {dimension_semantics = [], scalar_prefetch = 0 : i64, scratch_operands = 3 : i64, tpu.core_type = #tpu.core_type<tc>} {
    %cst = arith.constant 0.000000e+00 : f32
    %0 = vector.broadcast %cst : f32 to vector<2x128xf32>
    %c0 = arith.constant 0 : index
    %c0_0 = arith.constant 0 : index
    %1 = vector.load %arg14[%c0, %c0_0] : memref<2x128xf32, #tpu.memory_space<vmem>>, vector<2x128xf32>
    tpu.vector_store %arg14[%c0, %c0_0], %0 {strides = array<i32>} : memref<2x128xf32, #tpu.memory_space<vmem>>, vector<2x128xf32>,
    %c0_1 = arith.constant 0 : index
    %c0_2 = arith.constant 0 : index
    %2 = vector.load %arg3[%c0_1, %c0_2] : memref<2x8xf32, #tpu.memory_space<vmem>>, vector<2x8xf32>
    %c0_3 = arith.constant 0 : index
    %c0_4 = arith.constant 0 : index
    %3 = vector.load %arg14[%c0_3, %c0_4] : memref<2x128xf32, #tpu.memory_space<vmem>>, vector<2x8xf32>
    tpu.vector_store %arg14[%c0_3, %c0_4], %2 {strides = array<i32>} : memref<2x128xf32, #tpu.memory_space<vmem>>, vector<2x8xf32>,
    %cst_5 = arith.constant 0.000000e+00 : f32
    %4 = vector.broadcast %cst_5 : f32 to vector<2x128xf32>
    %c0_6 = arith.constant 0 : index
    %c0_7 = arith.constant 0 : index
    %5 = vector.load %arg15[%c0_6, %c0_7] : memref<2x128xf32, #tpu.memory_space<vmem>>, vector<2x128xf32>
    tpu.vector_store %arg15[%c0_6, %c0_7], %4 {strides = array<i32>} : memref<2x128xf32, #tpu.memory_space<vmem>>, vector<2x128xf32>,
    %c0_8 = arith.constant 0 : index
    %c0_9 = arith.constant 0 : index
    %6 = vector.load %arg4[%c0_8, %c0_9] : memref<2x16xf32, #tpu.memory_space<vmem>>, vector<2x16xf32>
    %c0_10 = arith.constant 0 : index
    %c0_11 = arith.constant 0 : index
    %7 = vector.load %arg15[%c0_10, %c0_11] : memref<2x128xf32, #tpu.memory_space<vmem>>, vector<2x16xf32>
    tpu.vector_store %arg15[%c0_10, %c0_11], %6 {strides = array<i32>} : memref<2x128xf32, #tpu.memory_space<vmem>>, vector<2x16xf32>,
    %cst_12 = arith.constant 0.000000e+00 : f32
    %8 = vector.broadcast %cst_12 : f32 to vector<2x128xf32>
    %c0_13 = arith.constant 0 : index
    %c0_14 = arith.constant 0 : index
    %9 = vector.load %arg13[%c0_13, %c0_14] : memref<2x128xf32, #tpu.memory_space<vmem>>, vector<2x128xf32>
    tpu.vector_store %arg13[%c0_13, %c0_14], %8 {strides = array<i32>} : memref<2x128xf32, #tpu.memory_space<vmem>>, vector<2x128xf32>,
    %c0_15 = arith.constant 0 : index
    %c0_16 = arith.constant 0 : index
    %10 = vector.load %arg2[%c0_15, %c0_16] : memref<2x16xf32, #tpu.memory_space<vmem>>, vector<2x16xf32>
    %c0_17 = arith.constant 0 : index
    %c0_18 = arith.constant 0 : index
    %11 = vector.load %arg13[%c0_17, %c0_18] : memref<2x128xf32, #tpu.memory_space<vmem>>, vector<2x16xf32>
    tpu.vector_store %arg13[%c0_17, %c0_18], %10 {strides = array<i32>} : memref<2x128xf32, #tpu.memory_space<vmem>>, vector<2x16xf32>,
    %c0_19 = arith.constant 0 : index
    %c0_20 = arith.constant 0 : index
    %12 = vector.load %arg14[%c0_19, %c0_20] : memref<2x128xf32, #tpu.memory_space<vmem>>, vector<2x128xf32>
    %13 = arith.truncf %12 : vector<2x128xf32> to vector<2x128xbf16>
    %c0_21 = arith.constant 0 : index
    %c0_22 = arith.constant 0 : index
    %14 = vector.load %arg5[%c0_21, %c0_22] : memref<128x128xbf16, #tpu.memory_space<vmem>>, vector<128x128xbf16>
    %cst_23 = arith.constant dense<0.000000e+00> : vector<2x128xf32>
    %15 = tpu.matmul %13, %14, %cst_23 {dimension_numbers = #tpu.dot_dimension_numbers<[1], [0], [0], [1], [0, 0, 1, 1], [], []>} : vector<2x128xbf16>, vector<128x128xbf16>, vector<2x128xf32> -> vector<2x128xf32>
    %c0_24 = arith.constant 0 : index
    %c0_25 = arith.constant 0 : index
    %16 = vector.load %arg15[%c0_24, %c0_25] : memref<2x128xf32, #tpu.memory_space<vmem>>, vector<2x128xf32>
    %17 = arith.truncf %16 : vector<2x128xf32> to vector<2x128xbf16>
    %c0_26 = arith.constant 0 : index
    %c0_27 = arith.constant 0 : index
    %18 = vector.load %arg6[%c0_26, %c0_27] : memref<128x128xbf16, #tpu.memory_space<vmem>>, vector<128x128xbf16>
    %cst_28 = arith.constant dense<0.000000e+00> : vector<2x128xf32>
    %19 = tpu.matmul %17, %18, %cst_28 {dimension_numbers = #tpu.dot_dimension_numbers<[1], [0], [0], [1], [0, 0, 1, 1], [], []>} : vector<2x128xbf16>, vector<128x128xbf16>, vector<2x128xf32> -> vector<2x128xf32>
    %20 = arith.addf %15, %19 : vector<2x128xf32>
    %c0_29 = arith.constant 0 : index
    %c0_30 = arith.constant 0 : index
    %21 = vector.load %arg13[%c0_29, %c0_30] : memref<2x128xf32, #tpu.memory_space<vmem>>, vector<2x128xf32>
    %c0_31 = arith.constant 0 : index
    %c0_32 = arith.constant 0 : index
    %22 = vector.load %arg7[%c0_31, %c0_32] : memref<128x128xbf16, #tpu.memory_space<vmem>>, vector<128x128xbf16>
    %c0_33 = arith.constant 0 : index
    %c0_34 = arith.constant 0 : index
    %23 = vector.load %arg8[%c0_33, %c0_34] : memref<128x128xbf16, #tpu.memory_space<vmem>>, vector<128x128xbf16>
    %c0_35 = arith.constant 0 : index
    %c0_36 = arith.constant 0 : index
    %24 = vector.load %arg10[%c0_35, %c0_36] : memref<128x128xbf16, #tpu.memory_space<vmem>>, vector<128x128xbf16>
    %c0_37 = arith.constant 0 : index
    %c0_38 = arith.constant 0 : index
    %25 = vector.load %arg9[%c0_37, %c0_38] : memref<1x128xf32, #tpu.memory_space<vmem>>, vector<1x128xf32>
    %c0_39 = arith.constant 0 : index
    %c0_40 = arith.constant 0 : index
    %26 = vector.load %arg11[%c0_39, %c0_40] : memref<1x128xf32, #tpu.memory_space<vmem>>, vector<1x128xf32>
    %c0_41 = arith.constant 0 : index
    %27 = memref.load %arg0[%c0_41] : memref<40xf32, #tpu.memory_space<smem>>
    %c1 = arith.constant 1 : index
    %28 = memref.load %arg0[%c1] : memref<40xf32, #tpu.memory_space<smem>>
    %c0_42 = arith.constant 0 : index
    %c0_43 = arith.constant 0 : index
    %29 = vector.load %arg1[%c0_42, %c0_43] : memref<10x128xf32, #tpu.memory_space<vmem>>, vector<1x128xf32>
    %30 = arith.truncf %21 : vector<2x128xf32> to vector<2x128xbf16>
    %cst_44 = arith.constant dense<0.000000e+00> : vector<2x128xf32>
    %31 = tpu.matmul %30, %22, %cst_44 {dimension_numbers = #tpu.dot_dimension_numbers<[1], [0], [0], [1], [0, 0, 1, 1], [], []>} : vector<2x128xbf16>, vector<128x128xbf16>, vector<2x128xf32> -> vector<2x128xf32>
    %32 = arith.addf %31, %20 : vector<2x128xf32>
    %33 = vector.broadcast %29 : vector<1x128xf32> to vector<2x128xf32>
    %34 = arith.addf %32, %33 : vector<2x128xf32>
    %cst_45 = arith.constant 0.000000e+00 : f32
    %35 = vector.broadcast %cst_45 : f32 to vector<2x128xf32>
    %36 = arith.maximumf %34, %35 : vector<2x128xf32>
    %37 = arith.truncf %36 : vector<2x128xf32> to vector<2x128xbf16>
    %cst_46 = arith.constant dense<0.000000e+00> : vector<2x128xf32>
    %38 = tpu.matmul %37, %23, %cst_46 {dimension_numbers = #tpu.dot_dimension_numbers<[1], [0], [0], [1], [0, 0, 1, 1], [], []>} : vector<2x128xbf16>, vector<128x128xbf16>, vector<2x128xf32> -> vector<2x128xf32>
    %39 = vector.broadcast %25 : vector<1x128xf32> to vector<2x128xf32>
    %40 = arith.addf %38, %39 : vector<2x128xf32>
    %cst_47 = arith.constant 0.000000e+00 : f32
    %41 = vector.broadcast %cst_47 : f32 to vector<2x128xf32>
    %42 = arith.maximumf %40, %41 : vector<2x128xf32>
    %43 = arith.truncf %42 : vector<2x128xf32> to vector<2x128xbf16>
    %cst_48 = arith.constant dense<0.000000e+00> : vector<2x128xf32>
    %44 = tpu.matmul %43, %24, %cst_48 {dimension_numbers = #tpu.dot_dimension_numbers<[1], [0], [0], [1], [0, 0, 1, 1], [], []>} : vector<2x128xbf16>, vector<128x128xbf16>, vector<2x128xf32> -> vector<2x128xf32>
    %45 = vector.broadcast %26 : vector<1x128xf32> to vector<2x128xf32>
    %46 = arith.addf %44, %45 : vector<2x128xf32>
    %47 = vector.broadcast %27 : f32 to vector<2x128xf32>
    %48 = arith.mulf %47, %21 : vector<2x128xf32>
    %49 = vector.broadcast %28 : f32 to vector<2x128xf32>
    %50 = arith.mulf %49, %46 : vector<2x128xf32>
    %51 = arith.subf %48, %50 : vector<2x128xf32>
    %c4 = arith.constant 4 : index
    %52 = memref.load %arg0[%c4] : memref<40xf32, #tpu.memory_space<smem>>
    %c5 = arith.constant 5 : index
    %53 = memref.load %arg0[%c5] : memref<40xf32, #tpu.memory_space<smem>>
    %c1_49 = arith.constant 1 : index
    %c0_50 = arith.constant 0 : index
    %54 = vector.load %arg1[%c1_49, %c0_50] : memref<10x128xf32, #tpu.memory_space<vmem>>, vector<1x128xf32>
    %55 = arith.truncf %51 : vector<2x128xf32> to vector<2x128xbf16>
    %cst_51 = arith.constant dense<0.000000e+00> : vector<2x128xf32>
    %56 = tpu.matmul %55, %22, %cst_51 {dimension_numbers = #tpu.dot_dimension_numbers<[1], [0], [0], [1], [0, 0, 1, 1], [], []>} : vector<2x128xbf16>, vector<128x128xbf16>, vector<2x128xf32> -> vector<2x128xf32>
    %57 = arith.addf %56, %20 : vector<2x128xf32>
    %58 = vector.broadcast %54 : vector<1x128xf32> to vector<2x128xf32>
    %59 = arith.addf %57, %58 : vector<2x128xf32>
    %cst_52 = arith.constant 0.000000e+00 : f32
    %60 = vector.broadcast %cst_52 : f32 to vector<2x128xf32>
    %61 = arith.maximumf %59, %60 : vector<2x128xf32>
    %62 = arith.truncf %61 : vector<2x128xf32> to vector<2x128xbf16>
    %cst_53 = arith.constant dense<0.000000e+00> : vector<2x128xf32>
    %63 = tpu.matmul %62, %23, %cst_53 {dimension_numbers = #tpu.dot_dimension_numbers<[1], [0], [0], [1], [0, 0, 1, 1], [], []>} : vector<2x128xbf16>, vector<128x128xbf16>, vector<2x128xf32> -> vector<2x128xf32>
    %64 = vector.broadcast %25 : vector<1x128xf32> to vector<2x128xf32>
    %65 = arith.addf %63, %64 : vector<2x128xf32>
    %cst_54 = arith.constant 0.000000e+00 : f32
    %66 = vector.broadcast %cst_54 : f32 to vector<2x128xf32>
    %67 = arith.maximumf %65, %66 : vector<2x128xf32>
    %68 = arith.truncf %67 : vector<2x128xf32> to vector<2x128xbf16>
    %cst_55 = arith.constant dense<0.000000e+00> : vector<2x128xf32>
    %69 = tpu.matmul %68, %24, %cst_55 {dimension_numbers = #tpu.dot_dimension_numbers<[1], [0], [0], [1], [0, 0, 1, 1], [], []>} : vector<2x128xbf16>, vector<128x128xbf16>, vector<2x128xf32> -> vector<2x128xf32>
    %70 = vector.broadcast %26 : vector<1x128xf32> to vector<2x128xf32>
    %71 = arith.addf %69, %70 : vector<2x128xf32>
    %72 = vector.broadcast %52 : f32 to vector<2x128xf32>
    %73 = arith.mulf %72, %51 : vector<2x128xf32>
    %74 = vector.broadcast %53 : f32 to vector<2x128xf32>
    %75 = arith.mulf %74, %71 : vector<2x128xf32>
    %76 = arith.subf %73, %75 : vector<2x128xf32>
    %c8 = arith.constant 8 : index
    %77 = memref.load %arg0[%c8] : memref<40xf32, #tpu.memory_space<smem>>
    %c9 = arith.constant 9 : index
    %78 = memref.load %arg0[%c9] : memref<40xf32, #tpu.memory_space<smem>>
    %c2 = arith.constant 2 : index
    %c0_56 = arith.constant 0 : index
    %79 = vector.load %arg1[%c2, %c0_56] : memref<10x128xf32, #tpu.memory_space<vmem>>, vector<1x128xf32>
    %80 = arith.truncf %76 : vector<2x128xf32> to vector<2x128xbf16>
    %cst_57 = arith.constant dense<0.000000e+00> : vector<2x128xf32>
    %81 = tpu.matmul %80, %22, %cst_57 {dimension_numbers = #tpu.dot_dimension_numbers<[1], [0], [0], [1], [0, 0, 1, 1], [], []>} : vector<2x128xbf16>, vector<128x128xbf16>, vector<2x128xf32> -> vector<2x128xf32>
    %82 = arith.addf %81, %20 : vector<2x128xf32>
    %83 = vector.broadcast %79 : vector<1x128xf32> to vector<2x128xf32>
    %84 = arith.addf %82, %83 : vector<2x128xf32>
    %cst_58 = arith.constant 0.000000e+00 : f32
    %85 = vector.broadcast %cst_58 : f32 to vector<2x128xf32>
    %86 = arith.maximumf %84, %85 : vector<2x128xf32>
    %87 = arith.truncf %86 : vector<2x128xf32> to vector<2x128xbf16>
    %cst_59 = arith.constant dense<0.000000e+00> : vector<2x128xf32>
    %88 = tpu.matmul %87, %23, %cst_59 {dimension_numbers = #tpu.dot_dimension_numbers<[1], [0], [0], [1], [0, 0, 1, 1], [], []>} : vector<2x128xbf16>, vector<128x128xbf16>, vector<2x128xf32> -> vector<2x128xf32>
    %89 = vector.broadcast %25 : vector<1x128xf32> to vector<2x128xf32>
    %90 = arith.addf %88, %89 : vector<2x128xf32>
    %cst_60 = arith.constant 0.000000e+00 : f32
    %91 = vector.broadcast %cst_60 : f32 to vector<2x128xf32>
    %92 = arith.maximumf %90, %91 : vector<2x128xf32>
    %93 = arith.truncf %92 : vector<2x128xf32> to vector<2x128xbf16>
    %cst_61 = arith.constant dense<0.000000e+00> : vector<2x128xf32>
    %94 = tpu.matmul %93, %24, %cst_61 {dimension_numbers = #tpu.dot_dimension_numbers<[1], [0], [0], [1], [0, 0, 1, 1], [], []>} : vector<2x128xbf16>, vector<128x128xbf16>, vector<2x128xf32> -> vector<2x128xf32>
    %95 = vector.broadcast %26 : vector<1x128xf32> to vector<2x128xf32>
    %96 = arith.addf %94, %95 : vector<2x128xf32>
    %97 = vector.broadcast %77 : f32 to vector<2x128xf32>
    %98 = arith.mulf %97, %76 : vector<2x128xf32>
    %99 = vector.broadcast %78 : f32 to vector<2x128xf32>
    %100 = arith.mulf %99, %96 : vector<2x128xf32>
    %101 = arith.subf %98, %100 : vector<2x128xf32>
    %c12 = arith.constant 12 : index
    %102 = memref.load %arg0[%c12] : memref<40xf32, #tpu.memory_space<smem>>
    %c13 = arith.constant 13 : index
    %103 = memref.load %arg0[%c13] : memref<40xf32, #tpu.memory_space<smem>>
    %c3 = arith.constant 3 : index
    %c0_62 = arith.constant 0 : index
    %104 = vector.load %arg1[%c3, %c0_62] : memref<10x128xf32, #tpu.memory_space<vmem>>, vector<1x128xf32>
    %105 = arith.truncf %101 : vector<2x128xf32> to vector<2x128xbf16>
    %cst_63 = arith.constant dense<0.000000e+00> : vector<2x128xf32>
    %106 = tpu.matmul %105, %22, %cst_63 {dimension_numbers = #tpu.dot_dimension_numbers<[1], [0], [0], [1], [0, 0, 1, 1], [], []>} : vector<2x128xbf16>, vector<128x128xbf16>, vector<2x128xf32> -> vector<2x128xf32>
    %107 = arith.addf %106, %20 : vector<2x128xf32>
    %108 = vector.broadcast %104 : vector<1x128xf32> to vector<2x128xf32>
    %109 = arith.addf %107, %108 : vector<2x128xf32>
    %cst_64 = arith.constant 0.000000e+00 : f32
    %110 = vector.broadcast %cst_64 : f32 to vector<2x128xf32>
    %111 = arith.maximumf %109, %110 : vector<2x128xf32>
    %112 = arith.truncf %111 : vector<2x128xf32> to vector<2x128xbf16>
    %cst_65 = arith.constant dense<0.000000e+00> : vector<2x128xf32>
    %113 = tpu.matmul %112, %23, %cst_65 {dimension_numbers = #tpu.dot_dimension_numbers<[1], [0], [0], [1], [0, 0, 1, 1], [], []>} : vector<2x128xbf16>, vector<128x128xbf16>, vector<2x128xf32> -> vector<2x128xf32>
    %114 = vector.broadcast %25 : vector<1x128xf32> to vector<2x128xf32>
    %115 = arith.addf %113, %114 : vector<2x128xf32>
    %cst_66 = arith.constant 0.000000e+00 : f32
    %116 = vector.broadcast %cst_66 : f32 to vector<2x128xf32>
    %117 = arith.maximumf %115, %116 : vector<2x128xf32>
    %118 = arith.truncf %117 : vector<2x128xf32> to vector<2x128xbf16>
    %cst_67 = arith.constant dense<0.000000e+00> : vector<2x128xf32>
    %119 = tpu.matmul %118, %24, %cst_67 {dimension_numbers = #tpu.dot_dimension_numbers<[1], [0], [0], [1], [0, 0, 1, 1], [], []>} : vector<2x128xbf16>, vector<128x128xbf16>, vector<2x128xf32> -> vector<2x128xf32>
    %120 = vector.broadcast %26 : vector<1x128xf32> to vector<2x128xf32>
    %121 = arith.addf %119, %120 : vector<2x128xf32>
    %122 = vector.broadcast %102 : f32 to vector<2x128xf32>
    %123 = arith.mulf %122, %101 : vector<2x128xf32>
    %124 = vector.broadcast %103 : f32 to vector<2x128xf32>
    %125 = arith.mulf %124, %121 : vector<2x128xf32>
    %126 = arith.subf %123, %125 : vector<2x128xf32>
    %c16 = arith.constant 16 : index
    %127 = memref.load %arg0[%c16] : memref<40xf32, #tpu.memory_space<smem>>
    %c17 = arith.constant 17 : index
    %128 = memref.load %arg0[%c17] : memref<40xf32, #tpu.memory_space<smem>>
    %c4_68 = arith.constant 4 : index
    %c0_69 = arith.constant 0 : index
    %129 = vector.load %arg1[%c4_68, %c0_69] : memref<10x128xf32, #tpu.memory_space<vmem>>, vector<1x128xf32>
    %130 = arith.truncf %126 : vector<2x128xf32> to vector<2x128xbf16>
    %cst_70 = arith.constant dense<0.000000e+00> : vector<2x128xf32>
    %131 = tpu.matmul %130, %22, %cst_70 {dimension_numbers = #tpu.dot_dimension_numbers<[1], [0], [0], [1], [0, 0, 1, 1], [], []>} : vector<2x128xbf16>, vector<128x128xbf16>, vector<2x128xf32> -> vector<2x128xf32>
    %132 = arith.addf %131, %20 : vector<2x128xf32>
    %133 = vector.broadcast %129 : vector<1x128xf32> to vector<2x128xf32>
    %134 = arith.addf %132, %133 : vector<2x128xf32>
    %cst_71 = arith.constant 0.000000e+00 : f32
    %135 = vector.broadcast %cst_71 : f32 to vector<2x128xf32>
    %136 = arith.maximumf %134, %135 : vector<2x128xf32>
    %137 = arith.truncf %136 : vector<2x128xf32> to vector<2x128xbf16>
    %cst_72 = arith.constant dense<0.000000e+00> : vector<2x128xf32>
    %138 = tpu.matmul %137, %23, %cst_72 {dimension_numbers = #tpu.dot_dimension_numbers<[1], [0], [0], [1], [0, 0, 1, 1], [], []>} : vector<2x128xbf16>, vector<128x128xbf16>, vector<2x128xf32> -> vector<2x128xf32>
    %139 = vector.broadcast %25 : vector<1x128xf32> to vector<2x128xf32>
    %140 = arith.addf %138, %139 : vector<2x128xf32>
    %cst_73 = arith.constant 0.000000e+00 : f32
    %141 = vector.broadcast %cst_73 : f32 to vector<2x128xf32>
    %142 = arith.maximumf %140, %141 : vector<2x128xf32>
    %143 = arith.truncf %142 : vector<2x128xf32> to vector<2x128xbf16>
    %cst_74 = arith.constant dense<0.000000e+00> : vector<2x128xf32>
    %144 = tpu.matmul %143, %24, %cst_74 {dimension_numbers = #tpu.dot_dimension_numbers<[1], [0], [0], [1], [0, 0, 1, 1], [], []>} : vector<2x128xbf16>, vector<128x128xbf16>, vector<2x128xf32> -> vector<2x128xf32>
    %145 = vector.broadcast %26 : vector<1x128xf32> to vector<2x128xf32>
    %146 = arith.addf %144, %145 : vector<2x128xf32>
    %147 = vector.broadcast %127 : f32 to vector<2x128xf32>
    %148 = arith.mulf %147, %126 : vector<2x128xf32>
    %149 = vector.broadcast %128 : f32 to vector<2x128xf32>
    %150 = arith.mulf %149, %146 : vector<2x128xf32>
    %151 = arith.subf %148, %150 : vector<2x128xf32>
    %c20 = arith.constant 20 : index
    %152 = memref.load %arg0[%c20] : memref<40xf32, #tpu.memory_space<smem>>
    %c21 = arith.constant 21 : index
    %153 = memref.load %arg0[%c21] : memref<40xf32, #tpu.memory_space<smem>>
    %c5_75 = arith.constant 5 : index
    %c0_76 = arith.constant 0 : index
    %154 = vector.load %arg1[%c5_75, %c0_76] : memref<10x128xf32, #tpu.memory_space<vmem>>, vector<1x128xf32>
    %155 = arith.truncf %151 : vector<2x128xf32> to vector<2x128xbf16>
    %cst_77 = arith.constant dense<0.000000e+00> : vector<2x128xf32>
    %156 = tpu.matmul %155, %22, %cst_77 {dimension_numbers = #tpu.dot_dimension_numbers<[1], [0], [0], [1], [0, 0, 1, 1], [], []>} : vector<2x128xbf16>, vector<128x128xbf16>, vector<2x128xf32> -> vector<2x128xf32>
    %157 = arith.addf %156, %20 : vector<2x128xf32>
    %158 = vector.broadcast %154 : vector<1x128xf32> to vector<2x128xf32>
    %159 = arith.addf %157, %158 : vector<2x128xf32>
    %cst_78 = arith.constant 0.000000e+00 : f32
    %160 = vector.broadcast %cst_78 : f32 to vector<2x128xf32>
    %161 = arith.maximumf %159, %160 : vector<2x128xf32>
    %162 = arith.truncf %161 : vector<2x128xf32> to vector<2x128xbf16>
    %cst_79 = arith.constant dense<0.000000e+00> : vector<2x128xf32>
    %163 = tpu.matmul %162, %23, %cst_79 {dimension_numbers = #tpu.dot_dimension_numbers<[1], [0], [0], [1], [0, 0, 1, 1], [], []>} : vector<2x128xbf16>, vector<128x128xbf16>, vector<2x128xf32> -> vector<2x128xf32>
    %164 = vector.broadcast %25 : vector<1x128xf32> to vector<2x128xf32>
    %165 = arith.addf %163, %164 : vector<2x128xf32>
    %cst_80 = arith.constant 0.000000e+00 : f32
    %166 = vector.broadcast %cst_80 : f32 to vector<2x128xf32>
    %167 = arith.maximumf %165, %166 : vector<2x128xf32>
    %168 = arith.truncf %167 : vector<2x128xf32> to vector<2x128xbf16>
    %cst_81 = arith.constant dense<0.000000e+00> : vector<2x128xf32>
    %169 = tpu.matmul %168, %24, %cst_81 {dimension_numbers = #tpu.dot_dimension_numbers<[1], [0], [0], [1], [0, 0, 1, 1], [], []>} : vector<2x128xbf16>, vector<128x128xbf16>, vector<2x128xf32> -> vector<2x128xf32>
    %170 = vector.broadcast %26 : vector<1x128xf32> to vector<2x128xf32>
    %171 = arith.addf %169, %170 : vector<2x128xf32>
    %172 = vector.broadcast %152 : f32 to vector<2x128xf32>
    %173 = arith.mulf %172, %151 : vector<2x128xf32>
    %174 = vector.broadcast %153 : f32 to vector<2x128xf32>
    %175 = arith.mulf %174, %171 : vector<2x128xf32>
    %176 = arith.subf %173, %175 : vector<2x128xf32>
    %c24 = arith.constant 24 : index
    %177 = memref.load %arg0[%c24] : memref<40xf32, #tpu.memory_space<smem>>
    %c25 = arith.constant 25 : index
    %178 = memref.load %arg0[%c25] : memref<40xf32, #tpu.memory_space<smem>>
    %c6 = arith.constant 6 : index
    %c0_82 = arith.constant 0 : index
    %179 = vector.load %arg1[%c6, %c0_82] : memref<10x128xf32, #tpu.memory_space<vmem>>, vector<1x128xf32>
    %180 = arith.truncf %176 : vector<2x128xf32> to vector<2x128xbf16>
    %cst_83 = arith.constant dense<0.000000e+00> : vector<2x128xf32>
    %181 = tpu.matmul %180, %22, %cst_83 {dimension_numbers = #tpu.dot_dimension_numbers<[1], [0], [0], [1], [0, 0, 1, 1], [], []>} : vector<2x128xbf16>, vector<128x128xbf16>, vector<2x128xf32> -> vector<2x128xf32>
    %182 = arith.addf %181, %20 : vector<2x128xf32>
    %183 = vector.broadcast %179 : vector<1x128xf32> to vector<2x128xf32>
    %184 = arith.addf %182, %183 : vector<2x128xf32>
    %cst_84 = arith.constant 0.000000e+00 : f32
    %185 = vector.broadcast %cst_84 : f32 to vector<2x128xf32>
    %186 = arith.maximumf %184, %185 : vector<2x128xf32>
    %187 = arith.truncf %186 : vector<2x128xf32> to vector<2x128xbf16>
    %cst_85 = arith.constant dense<0.000000e+00> : vector<2x128xf32>
    %188 = tpu.matmul %187, %23, %cst_85 {dimension_numbers = #tpu.dot_dimension_numbers<[1], [0], [0], [1], [0, 0, 1, 1], [], []>} : vector<2x128xbf16>, vector<128x128xbf16>, vector<2x128xf32> -> vector<2x128xf32>
    %189 = vector.broadcast %25 : vector<1x128xf32> to vector<2x128xf32>
    %190 = arith.addf %188, %189 : vector<2x128xf32>
    %cst_86 = arith.constant 0.000000e+00 : f32
    %191 = vector.broadcast %cst_86 : f32 to vector<2x128xf32>
    %192 = arith.maximumf %190, %191 : vector<2x128xf32>
    %193 = arith.truncf %192 : vector<2x128xf32> to vector<2x128xbf16>
    %cst_87 = arith.constant dense<0.000000e+00> : vector<2x128xf32>
    %194 = tpu.matmul %193, %24, %cst_87 {dimension_numbers = #tpu.dot_dimension_numbers<[1], [0], [0], [1], [0, 0, 1, 1], [], []>} : vector<2x128xbf16>, vector<128x128xbf16>, vector<2x128xf32> -> vector<2x128xf32>
    %195 = vector.broadcast %26 : vector<1x128xf32> to vector<2x128xf32>
    %196 = arith.addf %194, %195 : vector<2x128xf32>
    %197 = vector.broadcast %177 : f32 to vector<2x128xf32>
    %198 = arith.mulf %197, %176 : vector<2x128xf32>
    %199 = vector.broadcast %178 : f32 to vector<2x128xf32>
    %200 = arith.mulf %199, %196 : vector<2x128xf32>
    %201 = arith.subf %198, %200 : vector<2x128xf32>
    %c28 = arith.constant 28 : index
    %202 = memref.load %arg0[%c28] : memref<40xf32, #tpu.memory_space<smem>>
    %c29 = arith.constant 29 : index
    %203 = memref.load %arg0[%c29] : memref<40xf32, #tpu.memory_space<smem>>
    %c7 = arith.constant 7 : index
    %c0_88 = arith.constant 0 : index
    %204 = vector.load %arg1[%c7, %c0_88] : memref<10x128xf32, #tpu.memory_space<vmem>>, vector<1x128xf32>
    %205 = arith.truncf %201 : vector<2x128xf32> to vector<2x128xbf16>
    %cst_89 = arith.constant dense<0.000000e+00> : vector<2x128xf32>
    %206 = tpu.matmul %205, %22, %cst_89 {dimension_numbers = #tpu.dot_dimension_numbers<[1], [0], [0], [1], [0, 0, 1, 1], [], []>} : vector<2x128xbf16>, vector<128x128xbf16>, vector<2x128xf32> -> vector<2x128xf32>
    %207 = arith.addf %206, %20 : vector<2x128xf32>
    %208 = vector.broadcast %204 : vector<1x128xf32> to vector<2x128xf32>
    %209 = arith.addf %207, %208 : vector<2x128xf32>
    %cst_90 = arith.constant 0.000000e+00 : f32
    %210 = vector.broadcast %cst_90 : f32 to vector<2x128xf32>
    %211 = arith.maximumf %209, %210 : vector<2x128xf32>
    %212 = arith.truncf %211 : vector<2x128xf32> to vector<2x128xbf16>
    %cst_91 = arith.constant dense<0.000000e+00> : vector<2x128xf32>
    %213 = tpu.matmul %212, %23, %cst_91 {dimension_numbers = #tpu.dot_dimension_numbers<[1], [0], [0], [1], [0, 0, 1, 1], [], []>} : vector<2x128xbf16>, vector<128x128xbf16>, vector<2x128xf32> -> vector<2x128xf32>
    %214 = vector.broadcast %25 : vector<1x128xf32> to vector<2x128xf32>
    %215 = arith.addf %213, %214 : vector<2x128xf32>
    %cst_92 = arith.constant 0.000000e+00 : f32
    %216 = vector.broadcast %cst_92 : f32 to vector<2x128xf32>
    %217 = arith.maximumf %215, %216 : vector<2x128xf32>
    %218 = arith.truncf %217 : vector<2x128xf32> to vector<2x128xbf16>
    %cst_93 = arith.constant dense<0.000000e+00> : vector<2x128xf32>
    %219 = tpu.matmul %218, %24, %cst_93 {dimension_numbers = #tpu.dot_dimension_numbers<[1], [0], [0], [1], [0, 0, 1, 1], [], []>} : vector<2x128xbf16>, vector<128x128xbf16>, vector<2x128xf32> -> vector<2x128xf32>
    %220 = vector.broadcast %26 : vector<1x128xf32> to vector<2x128xf32>
    %221 = arith.addf %219, %220 : vector<2x128xf32>
    %222 = vector.broadcast %202 : f32 to vector<2x128xf32>
    %223 = arith.mulf %222, %201 : vector<2x128xf32>
    %224 = vector.broadcast %203 : f32 to vector<2x128xf32>
    %225 = arith.mulf %224, %221 : vector<2x128xf32>
    %226 = arith.subf %223, %225 : vector<2x128xf32>
    %c32 = arith.constant 32 : index
    %227 = memref.load %arg0[%c32] : memref<40xf32, #tpu.memory_space<smem>>
    %c33 = arith.constant 33 : index
    %228 = memref.load %arg0[%c33] : memref<40xf32, #tpu.memory_space<smem>>
    %c8_94 = arith.constant 8 : index
    %c0_95 = arith.constant 0 : index
    %229 = vector.load %arg1[%c8_94, %c0_95] : memref<10x128xf32, #tpu.memory_space<vmem>>, vector<1x128xf32>
    %230 = arith.truncf %226 : vector<2x128xf32> to vector<2x128xbf16>
    %cst_96 = arith.constant dense<0.000000e+00> : vector<2x128xf32>
    %231 = tpu.matmul %230, %22, %cst_96 {dimension_numbers = #tpu.dot_dimension_numbers<[1], [0], [0], [1], [0, 0, 1, 1], [], []>} : vector<2x128xbf16>, vector<128x128xbf16>, vector<2x128xf32> -> vector<2x128xf32>
    %232 = arith.addf %231, %20 : vector<2x128xf32>
    %233 = vector.broadcast %229 : vector<1x128xf32> to vector<2x128xf32>
    %234 = arith.addf %232, %233 : vector<2x128xf32>
    %cst_97 = arith.constant 0.000000e+00 : f32
    %235 = vector.broadcast %cst_97 : f32 to vector<2x128xf32>
    %236 = arith.maximumf %234, %235 : vector<2x128xf32>
    %237 = arith.truncf %236 : vector<2x128xf32> to vector<2x128xbf16>
    %cst_98 = arith.constant dense<0.000000e+00> : vector<2x128xf32>
    %238 = tpu.matmul %237, %23, %cst_98 {dimension_numbers = #tpu.dot_dimension_numbers<[1], [0], [0], [1], [0, 0, 1, 1], [], []>} : vector<2x128xbf16>, vector<128x128xbf16>, vector<2x128xf32> -> vector<2x128xf32>
    %239 = vector.broadcast %25 : vector<1x128xf32> to vector<2x128xf32>
    %240 = arith.addf %238, %239 : vector<2x128xf32>
    %cst_99 = arith.constant 0.000000e+00 : f32
    %241 = vector.broadcast %cst_99 : f32 to vector<2x128xf32>
    %242 = arith.maximumf %240, %241 : vector<2x128xf32>
    %243 = arith.truncf %242 : vector<2x128xf32> to vector<2x128xbf16>
    %cst_100 = arith.constant dense<0.000000e+00> : vector<2x128xf32>
    %244 = tpu.matmul %243, %24, %cst_100 {dimension_numbers = #tpu.dot_dimension_numbers<[1], [0], [0], [1], [0, 0, 1, 1], [], []>} : vector<2x128xbf16>, vector<128x128xbf16>, vector<2x128xf32> -> vector<2x128xf32>
    %245 = vector.broadcast %26 : vector<1x128xf32> to vector<2x128xf32>
    %246 = arith.addf %244, %245 : vector<2x128xf32>
    %247 = vector.broadcast %227 : f32 to vector<2x128xf32>
    %248 = arith.mulf %247, %226 : vector<2x128xf32>
    %249 = vector.broadcast %228 : f32 to vector<2x128xf32>
    %250 = arith.mulf %249, %246 : vector<2x128xf32>
    %251 = arith.subf %248, %250 : vector<2x128xf32>
    %c36 = arith.constant 36 : index
    %252 = memref.load %arg0[%c36] : memref<40xf32, #tpu.memory_space<smem>>
    %c37 = arith.constant 37 : index
    %253 = memref.load %arg0[%c37] : memref<40xf32, #tpu.memory_space<smem>>
    %c9_101 = arith.constant 9 : index
    %c0_102 = arith.constant 0 : index
    %254 = vector.load %arg1[%c9_101, %c0_102] : memref<10x128xf32, #tpu.memory_space<vmem>>, vector<1x128xf32>
    %255 = arith.truncf %251 : vector<2x128xf32> to vector<2x128xbf16>
    %cst_103 = arith.constant dense<0.000000e+00> : vector<2x128xf32>
    %256 = tpu.matmul %255, %22, %cst_103 {dimension_numbers = #tpu.dot_dimension_numbers<[1], [0], [0], [1], [0, 0, 1, 1], [], []>} : vector<2x128xbf16>, vector<128x128xbf16>, vector<2x128xf32> -> vector<2x128xf32>
    %257 = arith.addf %256, %20 : vector<2x128xf32>
    %258 = vector.broadcast %254 : vector<1x128xf32> to vector<2x128xf32>
    %259 = arith.addf %257, %258 : vector<2x128xf32>
    %cst_104 = arith.constant 0.000000e+00 : f32
    %260 = vector.broadcast %cst_104 : f32 to vector<2x128xf32>
    %261 = arith.maximumf %259, %260 : vector<2x128xf32>
    %262 = arith.truncf %261 : vector<2x128xf32> to vector<2x128xbf16>
    %cst_105 = arith.constant dense<0.000000e+00> : vector<2x128xf32>
    %263 = tpu.matmul %262, %23, %cst_105 {dimension_numbers = #tpu.dot_dimension_numbers<[1], [0], [0], [1], [0, 0, 1, 1], [], []>} : vector<2x128xbf16>, vector<128x128xbf16>, vector<2x128xf32> -> vector<2x128xf32>
    %264 = vector.broadcast %25 : vector<1x128xf32> to vector<2x128xf32>
    %265 = arith.addf %263, %264 : vector<2x128xf32>
    %cst_106 = arith.constant 0.000000e+00 : f32
    %266 = vector.broadcast %cst_106 : f32 to vector<2x128xf32>
    %267 = arith.maximumf %265, %266 : vector<2x128xf32>
    %268 = arith.truncf %267 : vector<2x128xf32> to vector<2x128xbf16>
    %cst_107 = arith.constant dense<0.000000e+00> : vector<2x128xf32>
    %269 = tpu.matmul %268, %24, %cst_107 {dimension_numbers = #tpu.dot_dimension_numbers<[1], [0], [0], [1], [0, 0, 1, 1], [], []>} : vector<2x128xbf16>, vector<128x128xbf16>, vector<2x128xf32> -> vector<2x128xf32>
    %270 = vector.broadcast %26 : vector<1x128xf32> to vector<2x128xf32>
    %271 = arith.addf %269, %270 : vector<2x128xf32>
    %272 = vector.broadcast %252 : f32 to vector<2x128xf32>
    %273 = arith.mulf %272, %251 : vector<2x128xf32>
    %274 = vector.broadcast %253 : f32 to vector<2x128xf32>
    %275 = arith.mulf %274, %271 : vector<2x128xf32>
    %276 = arith.subf %273, %275 : vector<2x128xf32>
    %c0_108 = arith.constant 0 : index
    %c0_109 = arith.constant 0 : index
    %277 = vector.load %arg12[%c0_108, %c0_109] : memref<2x128xf32, #tpu.memory_space<vmem>>, vector<2x128xf32>
    tpu.vector_store %arg12[%c0_108, %c0_109], %276 {strides = array<i32>} : memref<2x128xf32, #tpu.memory_space<vmem>>, vector<2x128xf32>,
    return
  }
}

</mosaic_0001>

<bundles_post_ra>
// kernel: sample.1
= control target key start
LH: loop header
LB: loop body
LE: loop exit
PB: predicated region body
PF: predicated region fallthrough
CT: control target
= control target key end

     0   :  { %17 = vsyncpa [#allocation8], 0  ;;  %s4129_s0 = inlined_call_operand.vmem [shape: f32[40], index: 0, kind: input, shape index: {}]   ;;  %s4130_s1 = inlined_call_operand.hbm [shape: f32[10,128], index: 1, kind: input, shape index: {}]   ;;  %s4131_s2 = inlined_call_operand.vmem [shape: f32[2,16], index: 2, kind: input, shape index: {}]   ;;  %s4132_s3 = inlined_call_operand.hbm [shape: f32[2,8], index: 3, kind: input, shape index: {}]   ;;  %s4133_s4 = inlined_call_operand.vmem [shape: f32[2,16], index: 4, kind: input, shape index: {}]   ;;  %s4134_s5 = inlined_call_operand.hbm [shape: bf16[128,128], index: 5, kind: input, shape index: {}]   ;;  %s4135_s6 = inlined_call_operand.hbm [shape: bf16[128,128], index: 6, kind: input, shape index: {}]   ;;  %s4136_s7 = inlined_call_operand.hbm [shape: bf16[128,128], index: 7, kind: input, shape index: {}]   ;;  %s4137_s8 = inlined_call_operand.hbm [shape: bf16[128,128], index: 8, kind: input, shape index: {}]   ;;  %s4138_s9 = inlined_call_operand.vmem [shape: f32[1,128], index: 9, kind: input, shape index: {}, may-alias: {9,11}]   ;;  %s4139_s10 = inlined_call_operand.hbm [shape: bf16[128,128], index: 10, kind: input, shape index: {}]   ;;  %s4140_s11 = inlined_call_operand.vmem [shape: f32[1,128], index: 11, kind: input, shape index: {}, may-alias: {9,11}]   ;;  %s4141_s12 = inlined_call_operand.hbm [shape: f32[2,128], index: 12, kind: output, shape index: {}]  }
   0x1   :  { %18 = vsyncpa [#allocation6], 0 }
   0x2   :  { %19 = vsyncpa [#allocation11], 0 }
   0x3   :  { %20 = vsyncpa [#allocation14], 0 }
   0x4   :  { %21 = vsyncpa [#allocation17], 0 }
   0x5   :  { %22 = vsyncpa [#allocation7], 0  ;;  %s3243_s21 = smov [#allocation10]  }
   0x6   :  { %s53_s22 = sshll.u32 %s3243_s21, 4  ;;  %s54_s22 = int_to_ptr.vmem [resolvable:$true] %s53_s22 }
   0x7   :  { %s3067_s23 = scalar_lea.vmem %s54_s22, 32  ;;  %p3072_p1 = scmp.lt.s32.totalorder %s54_s22, %s54_s22 }
   0x8   :  { %p3068_p0 = scmp.ne.s32.totalorder %s54_s22, %s3067_s23  ;;  %p3073_p2 = scmp.lt.s32.totalorder %s3067_s23, %s3067_s23 }
   0xa   :  { %p3074_p3 = por %p3073_p2, %p3072_p1 }
   0xc   :  { %p3075_p4 = pnand %p3074_p3, %p3068_p0 }
   0xe   :  { %3078 = shalt.err (!%p3075_p4)
}
   0xf   :  { %56 = dma.hbm_to_vmem [thread:$0]  %s4132_s3, 32, %s54_s22, [#allocation11]  }
  0x10   :  { %s3244_s26 = smov [#allocation13]   ;;  %s3245_s28 = smov [#allocation16]  }
  0x11   :  { %s76_s27 = sshll.u32 %s3244_s26, 4  ;;  %s100_s29 = sshll.u32 %s3245_s28, 4  ;;  %s77_s27 = int_to_ptr.vmem [resolvable:$true] %s76_s27  ;;  %s101_s29 = int_to_ptr.vmem [resolvable:$true] %s100_s29 }
  0x12   :  { %s3087_s30 = scalar_lea.vmem %s77_s27, 1024  ;;  %p3092_p6 = scmp.lt.s32.totalorder %s77_s27, %s77_s27 }
  0x13   :  { %p3088_p5 = scmp.ne.s32.totalorder %s77_s27, %s3087_s30  ;;  %p3093_p7 = scmp.lt.s32.totalorder %s3087_s30, %s3087_s30 }
  0x15   :  { %p3094_p8 = por %p3093_p7, %p3092_p6 }
  0x17   :  { %p3095_p9 = pnand %p3094_p8, %p3088_p5 }
  0x19   :  { %3098 = shalt.err (!%p3095_p9)
}
  0x1a   :  { %s3246_s13 = smov 64   ;;  %s3247_s14 = smov 4  }
  0x1b   :  { %82 = dma.hbm_to_vmem [thread:$0]  %s4135_s6, 1024, %s77_s27, [#allocation14], %s3246_s13, %s3246_s13, %s3247_s14  }
  0x1c   :  { %s29_s18 = sshll.u32 %s4129_s0, 4  ;;  %s3107_s19 = scalar_lea.vmem %s101_s29, 1024  ;;  %s30_s18 = int_to_ptr.vmem [resolvable:$true] %s29_s18 }
  0x1d   :  { %p3108_p10 = scmp.ne.s32.totalorder %s101_s29, %s3107_s19  ;;  %p3112_p11 = scmp.lt.s32.totalorder %s101_s29, %s101_s29 }
  0x1e   :  { %p3113_p12 = scmp.lt.s32.totalorder %s3107_s19, %s3107_s19 }
  0x20   :  { %p3114_p13 = por %p3113_p12, %p3112_p11 }
  0x22   :  { %p3115_p0 = pnand %p3114_p13, %p3108_p10 }
  0x24   :  { %3118 = shalt.err (!%p3115_p0)
}
  0x25   :  { %106 = dma.hbm_to_vmem [thread:$0]  %s4137_s8, 1024, %s101_s29, [#allocation17], %s3246_s13, %s3246_s13, %s3247_s14  }
  0x26   :  { %s3119_s6 = scalar_lea.vmem %s30_s18, 16  ;;  %p3124_p2 = scmp.lt.s32.totalorder %s30_s18, %s30_s18 }
  0x27   :  { %p3120_p1 = scmp.ne.s32.totalorder %s30_s18, %s3119_s6  ;;  %p3125_p3 = scmp.lt.s32.totalorder %s3119_s6, %s3119_s6 }
  0x29   :  { %p3126_p4 = por %p3125_p3, %p3124_p2 }
  0x2b   :  { %p3127_p5 = pnand %p3126_p4, %p3120_p1 }
  0x2d   :  { %3130 = shalt.err (!%p3127_p5)
}
  0x2e   :  { %s3248_s0 = smov [#allocation5]   ;;  %s3249_s22 = smov [#allocation9]  }
  0x2f   :  { %32 = dma.vmem_to_smem %s30_s18, 16, %s3248_s0, [#allocation8]  }
  0x30   :  { %s38_s23 = sshll.u32 %s3249_s22, 4  ;;  %s39_s23 = int_to_ptr.vmem [resolvable:$true] %s38_s23 }
  0x31   :  { %s3139_s24 = scalar_lea.vmem %s39_s23, 256  ;;  %p3144_p7 = scmp.lt.s32.totalorder %s39_s23, %s39_s23 }
  0x32   :  { %p3140_p6 = scmp.ne.s32.totalorder %s39_s23, %s3139_s24  ;;  %p3145_p8 = scmp.lt.s32.totalorder %s3139_s24, %s3139_s24 }
  0x34   :  { %p3146_p9 = por %p3145_p8, %p3144_p7 }
  0x36   :  { %p3147_p10 = pnand %p3146_p9, %p3140_p6 }
  0x38   :  { %3150 = shalt.err (!%p3147_p10)
}
  0x39   :  { %s3250_s8 = smov 128   ;;  %s3251_s25 = smov 8  }
  0x3a   :  { %44 = dma.hbm_to_vmem [thread:$0]  %s4130_s1, 256, %s39_s23, [#allocation6], %s3250_s8, %s3250_s8, %s3251_s25  }
  0x3b   :  { %s3252_s28 = smov [#allocation12]   ;;  %s3253_s30 = smov [#allocation15]  }
  0x3c   :  { %s64_s29 = sshll.u32 %s3252_s28, 4  ;;  %s88_s15 = sshll.u32 %s3253_s30, 4  ;;  %s65_s29 = int_to_ptr.vmem [resolvable:$true] %s64_s29  ;;  %s89_s15 = int_to_ptr.vmem [resolvable:$true] %s88_s15 }
  0x3d   :  { %s3159_s16 = scalar_lea.vmem %s65_s29, 1024  ;;  %p3164_p12 = scmp.lt.s32.totalorder %s65_s29, %s65_s29 }
  0x3e   :  { %p3160_p11 = scmp.ne.s32.totalorder %s65_s29, %s3159_s16  ;;  %p3165_p13 = scmp.lt.s32.totalorder %s3159_s16, %s3159_s16 }
  0x40   :  { %p3166_p0 = por %p3165_p13, %p3164_p12 }
  0x42   :  { %p3167_p1 = pnand %p3166_p0, %p3160_p11 }
  0x44   :  { %3170 = shalt.err (!%p3167_p1)
}
  0x45   :  { %70 = dma.hbm_to_vmem [thread:$0]  %s4134_s5, 1024, %s65_s29, [#allocation11], %s3246_s13, %s3246_s13, %s3247_s14  }
  0x46   :  { %s3179_s1 = scalar_lea.vmem %s89_s15, 1024  ;;  %p3184_p3 = scmp.lt.s32.totalorder %s89_s15, %s89_s15 }
  0x47   :  { %p3180_p2 = scmp.ne.s32.totalorder %s89_s15, %s3179_s1  ;;  %p3185_p4 = scmp.lt.s32.totalorder %s3179_s1, %s3179_s1 }
  0x49   :  { %p3186_p5 = por %p3185_p4, %p3184_p3 }
  0x4b   :  { %p3187_p6 = pnand %p3186_p5, %p3180_p2 }
  0x4d   :  { %3190 = shalt.err (!%p3187_p6)
}
  0x4e   :  { %94 = dma.hbm_to_vmem [thread:$0]  %s4136_s7, 1024, %s89_s15, [#allocation14], %s3246_s13, %s3246_s13, %s3247_s14  }
  0x4f   :  { %s3254_s20 = smov [#allocation18]  }
  0x50   :  { %s114_s21 = sshll.u32 %s3254_s20, 4  ;;  %s115_s21 = int_to_ptr.vmem [resolvable:$true] %s114_s21 }
  0x51   :  { %s3199_s6 = scalar_lea.vmem %s115_s21, 1024  ;;  %p3204_p8 = scmp.lt.s32.totalorder %s115_s21, %s115_s21 }
  0x52   :  { %p3200_p7 = scmp.ne.s32.totalorder %s115_s21, %s3199_s6  ;;  %p3205_p9 = scmp.lt.s32.totalorder %s3199_s6, %s3199_s6 }
  0x54   :  { %p3206_p10 = por %p3205_p9, %p3204_p8 }
  0x56   :  { %p3207_p11 = pnand %p3206_p10, %p3200_p7 }
  0x58   :  { %3210 = shalt.err (!%p3207_p11)
}
  0x59   :  { %120 = dma.hbm_to_vmem [thread:$0]  %s4139_s10, 1024, %s115_s21, [#allocation17], %s3246_s13, %s3246_s13, %s3247_s14  }
  0x5a   :  { %3231 = dma.done.wait [#allocation8], 16  }
  0x5b   :  { %3232 = vsyncadd [#allocation8], 4294967280 }
  0x5c   :  { %3233 = dma.done.wait [#allocation6], 256  }
  0x5d   :  { %3234 = vsyncadd [#allocation6], 4294967040 }
  0x5e   :  { %3235 = dma.done.wait [#allocation11], 1056  }
  0x5f   :  { %3236 = vsyncadd [#allocation11], 4294966240 }
  0x60   :  { %3237 = dma.done.wait [#allocation14], 2048  }
  0x61   :  { %3238 = vsyncadd [#allocation14], 4294965248 }
  0x62   :  { %3239 = dma.done.wait [#allocation17], 2048  }
  0x63   :  { %3240 = vsyncadd [#allocation17], 4294965248 }
  0x64   :  { %147 = sfence }
  0x65   :  { %v2993_v0 = vld [vmem:[#allocation13 + $0x38] sm:$0xff]   ;;  %v3255_v1 = vmov 0.0   ;;  %v2995_v3 = vld [vmem:[#allocation13 + $0x30] sm:$0xff]   ;;  %vm3256_vm0 = vmmov 0   ;;  %v2997_v5 = vld [vmem:[#allocation13 + $0x28] sm:$0xff]   ;;  %vm155_vm1 = vcmask 123904  }
  0x66   :  { %2338 = vmatprep.subr.bf16.mxu0 %v3255_v1  ;;  %149 = vst [vmem:[#allocation3] sm:$0x3] %v3255_v1  ;;  %153 = vst [vmem:[#allocation4] sm:$0x3] %v3255_v1  ;;  %2358 = vmatprep.subr.bf16.mxu1 %v3255_v1  ;;  %v2994_v2 = vld [vmem:[#allocation12 + $0x38] sm:$0xff]   ;;  %v2996_v4 = vld [vmem:[#allocation12 + $0x30] sm:$0xff]  }
  0x67   :  { %157 = vst [vmem:[#allocation2] sm:$0x3] %v3255_v1  ;;  %2339 = vmatpush3.bf16.msra.mxu0 %v2993_v0  ;;  %2354 = vmatprep.mubr.msk.bf16.mxu0 %vm3256_vm0, %v3255_v1  ;;  %v2998_v6 = vld [vmem:[#allocation12 + $0x28] sm:$0xff]   ;;  %v2999_v7 = vld [vmem:[#allocation13 + $0x20] sm:$0xff]   ;;  %v3001_v9 = vld [vmem:[#allocation13 + $0x18] sm:$0xff]   ;;  %vm151_vm2 = vcmask 58368  }
  0x68   :  { %2359 = vmatpush3.bf16.msra.mxu1 %v2994_v2  ;;  %2340 = vmatprep.subr.bf16.mxu0 %v3255_v1  ;;  %v3000_v8 = vld [vmem:[#allocation12 + $0x20] sm:$0xff]   ;;  %v3002_v10 = vld [vmem:[#allocation12 + $0x18] sm:$0xff]   ;;  %v154_v11 = vld [vmem:[%s4133_s4] sm:$0x3]  ;;  %s423_s22 = sld [smem:[#allocation5]]  ;;  %s3257_s4 = smov [#allocation19]  }
  0x69   :  { %2360 = vmatprep.subr.bf16.mxu1 %v3255_v1  ;;  %2374 = vmatprep.mubr.msk.bf16.mxu1 %vm3256_vm0, %v3255_v1  ;;  %v150_v12 = vld [vmem:[#allocation10] sm:$0x3]  ;;  %156 = vst.msk [vmem:[#allocation4] sm:$0x3] %vm155_vm1, %v154_v11  ;;  %v3003_v13 = vld [vmem:[#allocation13 + $0x10] sm:$0xff]   ;;  %v3005_v15 = vld [vmem:[#allocation13 + $0x8] sm:$0xff]  }
  0x6a   :  { %152 = vst.msk [vmem:[#allocation3] sm:$0x3] %vm151_vm2, %v150_v12  ;;  %v3004_v14 = vld [vmem:[#allocation12 + $0x10] sm:$0xff]   ;;  %v3006_v16 = vld [vmem:[#allocation12 + $0x8] sm:$0xff]   ;;  %v3007_v17 = vld [vmem:[#allocation13] sm:$0xff]   ;;  %s1995_s23 = sld [smem:[#allocation5 + $0x1]] }
  0x6b   :  { %2341 = vmatpush3.bf16.msra.mxu0 %v2995_v3  ;;  %v3008_v19 = vld [vmem:[#allocation12] sm:$0xff]   ;;  %v158_v21 = vld [vmem:[%s4131_s2] sm:$0x3]  ;;  %v3393_v22 = vld [vmem:[#allocation15 + $0x38] sm:$0xff]   ;;  %s2023_s25 = sld [smem:[#allocation5 + $0x4]]  ;;  %s1966_s13 = sshll.u32 %s3257_s4, 4  ;;  %s1967_s13 = int_to_ptr.vmem [resolvable:$true] %s1966_s13 }
  0x6c   :  { %2361 = vmatpush3.bf16.msra.mxu1 %v2996_v4  ;;  %2342 = vmatprep.subr.bf16.mxu0 %v3255_v1  ;;  %159 = vst.msk [vmem:[#allocation2] sm:$0x3] %vm155_vm1, %v158_v21  ;;  %v3397_v25 = vld [vmem:[#allocation15 + $0x30] sm:$0xff]   ;;  %v3406_v26 = vld [vmem:[#allocation15 + $0x28] sm:$0xff]   ;;  %v3410_v27 = vld [vmem:[#allocation15 + $0x20] sm:$0xff]   ;;  %s2024_s26 = sld [smem:[#allocation5 + $0x5]]  ;;  %p3216_p13 = scmp.lt.s32.totalorder %s1967_s13, %s1967_s13 }
  0x6d   :  { %2362 = vmatprep.subr.bf16.mxu1 %v3255_v1  ;;  %v3414_v28 = vld [vmem:[#allocation15 + $0x18] sm:$0xff]   ;;  %v3418_v29 = vld [vmem:[#allocation15 + $0x10] sm:$0xff]   ;;  %v3422_v30 = vld [vmem:[#allocation15 + $0x8] sm:$0xff]   ;;  %s2026_s27 = sld [smem:[#allocation5 + $0x8]]  ;;  %s3211_s2 = scalar_lea.vmem %s1967_s13, 32 }
  0x6e   :  { %v3426_v31 = vld [vmem:[#allocation15] sm:$0xff]   ;;  %v3437_v34 = vld [vmem:[#allocation16 + $0x38] sm:$0xff]   ;;  %v3440_v35 = vld [vmem:[#allocation16 + $0x30] sm:$0xff]   ;;  %s2027_s28 = sld [smem:[#allocation5 + $0x9]]  ;;  %p3212_p12 = scmp.ne.s32.totalorder %s1967_s13, %s3211_s2 }
  0x6f   :  { %2343 = vmatpush3.bf16.msra.mxu0 %v2997_v5  ;;  %v3444_v36 = vld [vmem:[#allocation16 + $0x28] sm:$0xff]   ;;  %v3448_v37 = vld [vmem:[#allocation16 + $0x20] sm:$0xff]   ;;  %v3452_v38 = vld [vmem:[#allocation16 + $0x18] sm:$0xff]   ;;  %s2029_s29 = sld [smem:[#allocation5 + $0xc]]  ;;  %p3217_p0 = scmp.lt.s32.totalorder %s3211_s2, %s3211_s2 }
  0x70   :  { %2363 = vmatpush3.bf16.msra.mxu1 %v2998_v6  ;;  %2344 = vmatprep.subr.bf16.mxu0 %v3255_v1  ;;  %v178_v18 = vld [vmem:[#allocation4] sm:$0x3]  ;;  %v3456_v39 = vld [vmem:[#allocation16 + $0x10] sm:$0xff]   ;;  %v3465_v41 = vld [vmem:[#allocation16] sm:$0xff]   ;;  %s2030_s30 = sld [smem:[#allocation5 + $0xd]] }
  0x71   :  { %2364 = vmatprep.subr.bf16.mxu1 %v3255_v1  ;;  %v160_v20 = vld [vmem:[#allocation3] sm:$0x3]  ;;  %v179_v23 = vpack.c.bf16 %v178_v18, %v178_v18  ;;  %v3469_v42 = vld [vmem:[#allocation18 + $0x38] sm:$0xff]   ;;  %v3472_v43 = vld [vmem:[#allocation18 + $0x30] sm:$0xff]   ;;  %s2032_s15 = sld [smem:[#allocation5 + $0x10]]  ;;  %p3218_p1 = por %p3217_p0, %p3216_p13 }
  0x72   :  { %v161_v24 = vpack.c.bf16 %v160_v20, %v160_v20  ;;  %v3461_v40 = vld [vmem:[#allocation16 + $0x8] sm:$0xff]   ;;  %v3480_v45 = vld [vmem:[#allocation18 + $0x20] sm:$0xff]   ;;  %v3484_v46 = vld [vmem:[#allocation18 + $0x18] sm:$0xff]   ;;  %s2033_s16 = sld [smem:[#allocation5 + $0x11]] }
  0x73   :  { %2345 = vmatpush3.bf16.msra.mxu0 %v2999_v7  ;;  %v3428_v32 = vld [vmem:[#allocation2] sm:$0x3]  ;;  %v3488_v47 = vld [vmem:[#allocation18 + $0x10] sm:$0xff]   ;;  %v2004_v57 = vld [vmem:[#allocation9] ss:$0 sm:$0xff]  ;;  %s2035_s3 = sld [smem:[#allocation5 + $0x14]]  ;;  %p3219_p2 = pnand %p3218_p1, %p3212_p12 }
  0x74   :  { %2365 = vmatpush3.bf16.msra.mxu1 %v3000_v8  ;;  %2346 = vmatprep.subr.bf16.mxu0 %v3255_v1  ;;  %v426_v33 = vpack.c.bf16 %v3428_v32, %v3428_v32  ;;  %v3476_v44 = vld [vmem:[#allocation18 + $0x28] sm:$0xff]   ;;  %v3518_v4 = vld [vmem:[#allocation18] sm:$0xff]   ;;  %s2036_s17 = sld [smem:[#allocation5 + $0x15]] }
  0x75   :  { %2366 = vmatprep.subr.bf16.mxu1 %v3255_v1  ;;  %v3514_v3 = vld [vmem:[#allocation18 + $0x8] sm:$0xff]   ;;  %s2038_s1 = sld [smem:[#allocation5 + $0x18]] }
  0x76   :  { %v3525_v5 = vld [vmem:[%s4138_s9] ss:$0 sm:$0xff]  ;;  %s2039_s18 = sld [smem:[#allocation5 + $0x19]] }
  0x77   :  { %2347 = vmatpush3.bf16.msra.mxu0 %v3001_v9  ;;  %s2042_s21 = sld [smem:[#allocation5 + $0x1d]] }
  0x78   :  { %2367 = vmatpush3.bf16.msra.mxu1 %v3002_v10  ;;  %2348 = vmatprep.subr.bf16.mxu0 %v3255_v1  ;;  %s2045_s0 = sld [smem:[#allocation5 + $0x21]] }
  0x79   :  { %2368 = vmatprep.subr.bf16.mxu1 %v3255_v1  ;;  %s2047_s7 = sld [smem:[#allocation5 + $0x24]] }
  0x7a   :  { %s2048_s10 = sld [smem:[#allocation5 + $0x25]] }
  0x7b   :  { %2349 = vmatpush3.bf16.msra.mxu0 %v3003_v13  ;;  %v3549_v13 = vld [vmem:[%s4140_s11] ss:$0 sm:$0xff] }
  0x7c   :  { %2369 = vmatpush3.bf16.msra.mxu1 %v3004_v14  ;;  %2350 = vmatprep.subr.bf16.mxu0 %v3255_v1  ;;  %v712_v14 = vstv %s423_s22 }
  0x7d   :  { %2370 = vmatprep.subr.bf16.mxu1 %v3255_v1  ;;  %v713_v18 = vmul.f32 %v712_v14, %v3428_v32  ;;  %v2025_v32 = vld [vmem:[#allocation9 + $0x1] ss:$0 sm:$0xff] }
  0x7f   :  { %2351 = vmatpush3.bf16.msra.mxu0 %v3005_v15 }
  0x80   :  { %2371 = vmatpush3.bf16.msra.mxu1 %v3006_v16  ;;  %2352 = vmatprep.subr.bf16.mxu0 %v3255_v1  ;;  %v714_v16 = vstv %s1995_s23 }
  0x81   :  { %2372 = vmatprep.subr.bf16.mxu1 %v3255_v1 }
  0x83   :  { %2353 = vmatpush3.bf16.msra.mxu0 %v3007_v17 }
  0x84   :  { %2373 = vmatpush3.bf16.msra.mxu1 %v3008_v19  ;;  %2378 = vmatprep.subr.bf16.mxu0 %v3255_v1 }
  0x85   :  { %2398 = vmatprep.subr.bf16.mxu1 %v3255_v1 }
  0x86   :  { %2355 = vmatmul.mubr.bf16.vlgmr.msra.gmra.mxu0 %v179_v23 }
  0x87   :  { %2375 = vmatmul.mubr.bf16.vlgmr.msra.gmra.mxu1 %v161_v24  ;;  %2379 = vmatpush3.bf16.msra.mxu0 %v3393_v22 }
  0x88   :  { %2380 = vmatprep.subr.bf16.mxu0 %v3255_v1  ;;  %2394 = vmatprep.mubr.msk.bf16.mxu0 %vm3256_vm0, %v3255_v1 }
  0x89   :  { %2414 = vmatprep.mubr.msk.bf16.mxu1 %vm3256_vm0, %v3255_v1  ;;  %2399 = vmatpush3.bf16.msra.mxu1 %v3437_v34 }
  0x8a   :  { %2400 = vmatprep.subr.bf16.mxu1 %v3255_v1 }
  0x8b   :  { %2381 = vmatpush3.bf16.msra.mxu0 %v3397_v25 }
  0x8c   :  { %2382 = vmatprep.subr.bf16.mxu0 %v3255_v1 }
  0x8d   :  { %2401 = vmatpush3.bf16.msra.mxu1 %v3440_v35 }
  0x8e   :  { %2402 = vmatprep.subr.bf16.mxu1 %v3255_v1 }
  0x8f   :  { %2383 = vmatpush3.bf16.msra.mxu0 %v3406_v26 }
  0x90   :  { %2384 = vmatprep.subr.bf16.mxu0 %v3255_v1 }
  0x91   :  { %2403 = vmatpush3.bf16.msra.mxu1 %v3444_v36 }
  0x92   :  { %2404 = vmatprep.subr.bf16.mxu1 %v3255_v1 }
  0x93   :  { %2385 = vmatpush3.bf16.msra.mxu0 %v3410_v27 }
  0x94   :  { %2386 = vmatprep.subr.bf16.mxu0 %v3255_v1 }
  0x95   :  { %2405 = vmatpush3.bf16.msra.mxu1 %v3448_v37 }
  0x96   :  { %2406 = vmatprep.subr.bf16.mxu1 %v3255_v1 }
  0x97   :  { %2387 = vmatpush3.bf16.msra.mxu0 %v3414_v28 }
  0x98   :  { %2388 = vmatprep.subr.bf16.mxu0 %v3255_v1 }
  0x99   :  { %2407 = vmatpush3.bf16.msra.mxu1 %v3452_v38 }
  0x9a   :  { %2408 = vmatprep.subr.bf16.mxu1 %v3255_v1 }
  0x9b   :  { %2389 = vmatpush3.bf16.msra.mxu0 %v3418_v29 }
  0x9c   :  { %2390 = vmatprep.subr.bf16.mxu0 %v3255_v1 }
  0x9d   :  { %2409 = vmatpush3.bf16.msra.mxu1 %v3456_v39 }
  0x9e   :  { %2410 = vmatprep.subr.bf16.mxu1 %v3255_v1 }
  0x9f   :  { %2391 = vmatpush3.bf16.msra.mxu0 %v3422_v30 }
  0xa0   :  { %2392 = vmatprep.subr.bf16.mxu0 %v3255_v1 }
  0xa1   :  { %2411 = vmatpush3.bf16.msra.mxu1 %v3461_v40 }
  0xa2   :  { %2412 = vmatprep.subr.bf16.mxu1 %v3255_v1 }
  0xa3   :  { %2393 = vmatpush3.bf16.msra.mxu0 %v3426_v31 }
  0xa4   :  { %2418 = vmatprep.subr.bf16.mxu0 %v3255_v1 }
  0xa5   :  { %2413 = vmatpush3.bf16.msra.mxu1 %v3465_v41 }
  0xa6   :  { %2395 = vmatmul.mubr.bf16.vlgmr.msra.gmra.mxu0 %v426_v33  ;;  %2438 = vmatprep.subr.bf16.mxu1 %v3255_v1 }
  0xa7   :  { %2434 = vmatprep.mubr.msk.bf16.mxu0 %vm3256_vm0, %v3255_v1  ;;  %2419 = vmatpush3.bf16.msra.mxu0 %v3469_v42 }
  0xa8   :  { %2420 = vmatprep.subr.bf16.mxu0 %v3255_v1 }
  0xab   :  { %2421 = vmatpush3.bf16.msra.mxu0 %v3472_v43 }
  0xac   :  { %2422 = vmatprep.subr.bf16.mxu0 %v3255_v1 }
  0xaf   :  { %2423 = vmatpush3.bf16.msra.mxu0 %v3476_v44 }
  0xb0   :  { %2424 = vmatprep.subr.bf16.mxu0 %v3255_v1 }
  0xb3   :  { %2425 = vmatpush3.bf16.msra.mxu0 %v3480_v45 }
  0xb4   :  { %2426 = vmatprep.subr.bf16.mxu0 %v3255_v1 }
  0xb7   :  { %2427 = vmatpush3.bf16.msra.mxu0 %v3484_v46 }
  0xb8   :  { %2428 = vmatprep.subr.bf16.mxu0 %v3255_v1 }
  0xbb   :  { %2429 = vmatpush3.bf16.msra.mxu0 %v3488_v47 }
  0xbc   :  { %2430 = vmatprep.subr.bf16.mxu0 %v3255_v1 }
  0xbf   :  { %2431 = vmatpush3.bf16.msra.mxu0 %v3514_v3 }
  0xc0   :  { %2432 = vmatprep.subr.bf16.mxu0 %v3255_v1 }
  0xc3   :  { %2433 = vmatpush3.bf16.msra.mxu0 %v3518_v4 }
  0xc4   :  { %2458 = vmatprep.subr.bf16.mxu0 %v3255_v1 }
 0x146   :  { %v278_v48 = vpop.f32.mrf.mxu0 }
 0x147   :  { %v366_v49 = vpop.f32.mrf.mxu1 }
 0x148   :  { %v2356_v50 = vpop.f32.mrf.mxu0  ;;  %v3493_v56 = vadd.f32 %v366_v49, %v278_v48 }
 0x149   :  { %v2376_v51 = vpop.f32.mrf.mxu1 }
 0x14a   :  { %v281_v52 = vpop.f32.mrf.mxu0 }
 0x14b   :  { %v369_v53 = vpop.f32.mrf.mxu1 }
 0x14c   :  { %v2357_v54 = vpop.f32.mrf.mxu0 }
 0x14d   :  { %v2377_v55 = vpop.f32.mrf.mxu1 }
 0x166   :  { %v509_v58 = vpop.f32.mrf.mxu0 }
 0x167   :  { %v510_v59 = vadd.f32 %v509_v58, %v3493_v56 }
 0x168   :  { %v2396_v60 = vpop.f32.mrf.mxu0 }
 0x169   :  { %v519_v61 = vadd.f32 %v2004_v57, %v510_v59 }
 0x16a   :  { %v512_v62 = vpop.f32.mrf.mxu0 }
 0x16b   :  { %v520_v63 = vmax.f32 %v519_v61, 0.0 }
 0x16c   :  { %v2397_v0 = vpop.f32.mrf.mxu0 }
 0x16d   :  { %v521_v2 = vpack.c.bf16 %v520_v63, %v520_v63 }
 0x16f   :  { %2415 = vmatmul.mubr.bf16.vlgmr.msra.gmra.mxu1 %v521_v2  ;;  %v850_v2 = vstv %s2023_s25 }
 0x170   :  { %2439 = vmatpush3.bf16.msra.mxu1 %v3393_v22  ;;  %2454 = vmatprep.mubr.msk.bf16.mxu1 %vm3256_vm0, %v3255_v1 }
 0x171   :  { %2440 = vmatprep.subr.bf16.mxu1 %v3255_v1 }
 0x174   :  { %2441 = vmatpush3.bf16.msra.mxu1 %v3397_v25 }
 0x175   :  { %2442 = vmatprep.subr.bf16.mxu1 %v3255_v1 }
 0x178   :  { %2443 = vmatpush3.bf16.msra.mxu1 %v3406_v26 }
 0x179   :  { %2444 = vmatprep.subr.bf16.mxu1 %v3255_v1 }
 0x17c   :  { %2445 = vmatpush3.bf16.msra.mxu1 %v3410_v27 }
 0x17d   :  { %2446 = vmatprep.subr.bf16.mxu1 %v3255_v1 }
 0x180   :  { %2447 = vmatpush3.bf16.msra.mxu1 %v3414_v28 }
 0x181   :  { %2448 = vmatprep.subr.bf16.mxu1 %v3255_v1 }
 0x184   :  { %2449 = vmatpush3.bf16.msra.mxu1 %v3418_v29 }
 0x185   :  { %2450 = vmatprep.subr.bf16.mxu1 %v3255_v1 }
 0x188   :  { %2451 = vmatpush3.bf16.msra.mxu1 %v3422_v30 }
 0x189   :  { %2452 = vmatprep.subr.bf16.mxu1 %v3255_v1 }
 0x18c   :  { %2453 = vmatpush3.bf16.msra.mxu1 %v3426_v31 }
 0x18d   :  { %2478 = vmatprep.subr.bf16.mxu1 %v3255_v1 }
 0x22f   :  { %v610_v6 = vpop.f32.mrf.mxu1 }
 0x230   :  { %v611_v7 = vadd.f32 %v3525_v5, %v610_v6  ;;  %v852_v6 = vstv %s2024_s26 }
 0x231   :  { %v2416_v8 = vpop.f32.mrf.mxu1 }
 0x232   :  { %v616_v9 = vmax.f32 %v611_v7, 0.0 }
 0x233   :  { %v613_v10 = vpop.f32.mrf.mxu1 }
 0x234   :  { %v617_v11 = vpack.c.bf16 %v616_v9, %v616_v9 }
 0x235   :  { %v2417_v12 = vpop.f32.mrf.mxu1 }
 0x236   :  { %2435 = vmatmul.mubr.bf16.vlgmr.msra.gmra.mxu0 %v617_v11 }
 0x237   :  { %2459 = vmatpush3.bf16.msra.mxu0 %v3437_v34  ;;  %2474 = vmatprep.mubr.msk.bf16.mxu0 %vm3256_vm0, %v3255_v1 }
 0x238   :  { %2460 = vmatprep.subr.bf16.mxu0 %v3255_v1 }
 0x23b   :  { %2461 = vmatpush3.bf16.msra.mxu0 %v3440_v35 }
 0x23c   :  { %2462 = vmatprep.subr.bf16.mxu0 %v3255_v1 }
 0x23f   :  { %2463 = vmatpush3.bf16.msra.mxu0 %v3444_v36 }
 0x240   :  { %2464 = vmatprep.subr.bf16.mxu0 %v3255_v1 }
 0x243   :  { %2465 = vmatpush3.bf16.msra.mxu0 %v3448_v37 }
 0x244   :  { %2466 = vmatprep.subr.bf16.mxu0 %v3255_v1 }
 0x247   :  { %2467 = vmatpush3.bf16.msra.mxu0 %v3452_v38 }
 0x248   :  { %2468 = vmatprep.subr.bf16.mxu0 %v3255_v1 }
 0x24b   :  { %2469 = vmatpush3.bf16.msra.mxu0 %v3456_v39 }
 0x24c   :  { %2470 = vmatprep.subr.bf16.mxu0 %v3255_v1 }
 0x24f   :  { %2471 = vmatpush3.bf16.msra.mxu0 %v3461_v40 }
 0x250   :  { %2472 = vmatprep.subr.bf16.mxu0 %v3255_v1 }
 0x253   :  { %2473 = vmatpush3.bf16.msra.mxu0 %v3465_v41 }
 0x254   :  { %2498 = vmatprep.subr.bf16.mxu0 %v3255_v1 }
 0x2f6   :  { %v706_v15 = vpop.f32.mrf.mxu0 }
 0x2f7   :  { %v707_v17 = vadd.f32 %v3549_v13, %v706_v15 }
 0x2f8   :  { %v2436_v19 = vpop.f32.mrf.mxu0 }
 0x2f9   :  { %v715_v20 = vmul.f32 %v714_v16, %v707_v17  ;;  %v2028_v16 = vld [vmem:[#allocation9 + $0x2] ss:$0 sm:$0xff] }
 0x2fa   :  { %v709_v21 = vpop.f32.mrf.mxu0 }
 0x2fb   :  { %v3553_v23 = vsub.f32 %v713_v18, %v715_v20 }
 0x2fc   :  { %v2437_v24 = vpop.f32.mrf.mxu0 }
 0x2fd   :  { %v720_v33 = vpack.c.bf16 %v3553_v23, %v3553_v23  ;;  %v851_v9 = vmul.f32 %v850_v2, %v3553_v23 }
 0x2ff   :  { %2455 = vmatmul.mubr.bf16.vlgmr.msra.gmra.mxu1 %v720_v33 }
 0x300   :  { %2479 = vmatpush3.bf16.msra.mxu1 %v3469_v42  ;;  %2494 = vmatprep.mubr.msk.bf16.mxu1 %vm3256_vm0, %v3255_v1 }
 0x301   :  { %2480 = vmatprep.subr.bf16.mxu1 %v3255_v1 }
 0x304   :  { %2481 = vmatpush3.bf16.msra.mxu1 %v3472_v43 }
 0x305   :  { %2482 = vmatprep.subr.bf16.mxu1 %v3255_v1 }
 0x308   :  { %2483 = vmatpush3.bf16.msra.mxu1 %v3476_v44 }
 0x309   :  { %2484 = vmatprep.subr.bf16.mxu1 %v3255_v1 }
 0x30c   :  { %2485 = vmatpush3.bf16.msra.mxu1 %v3480_v45 }
 0x30d   :  { %2486 = vmatprep.subr.bf16.mxu1 %v3255_v1 }
 0x310   :  { %2487 = vmatpush3.bf16.msra.mxu1 %v3484_v46 }
 0x311   :  { %2488 = vmatprep.subr.bf16.mxu1 %v3255_v1 }
 0x314   :  { %2489 = vmatpush3.bf16.msra.mxu1 %v3488_v47 }
 0x315   :  { %2490 = vmatprep.subr.bf16.mxu1 %v3255_v1 }
 0x318   :  { %2491 = vmatpush3.bf16.msra.mxu1 %v3514_v3 }
 0x319   :  { %2492 = vmatprep.subr.bf16.mxu1 %v3255_v1 }
 0x31c   :  { %2493 = vmatpush3.bf16.msra.mxu1 %v3518_v4 }
 0x31d   :  { %2518 = vmatprep.subr.bf16.mxu1 %v3255_v1 }
 0x3bf   :  { %v755_v48 = vpop.f32.mrf.mxu1 }
 0x3c0   :  { %v756_v49 = vadd.f32 %v755_v48, %v3493_v56 }
 0x3c1   :  { %v2456_v50 = vpop.f32.mrf.mxu1 }
 0x3c2   :  { %v765_v51 = vadd.f32 %v2025_v32, %v756_v49 }
 0x3c3   :  { %v758_v52 = vpop.f32.mrf.mxu1 }
 0x3c4   :  { %v766_v53 = vmax.f32 %v765_v51, 0.0 }
 0x3c5   :  { %v2457_v54 = vpop.f32.mrf.mxu1 }
 0x3c6   :  { %v767_v55 = vpack.c.bf16 %v766_v53, %v766_v53 }
 0x3c8   :  { %2475 = vmatmul.mubr.bf16.vlgmr.msra.gmra.mxu0 %v767_v55  ;;  %v988_v55 = vstv %s2026_s27 }
 0x3c9   :  { %2499 = vmatpush3.bf16.msra.mxu0 %v3393_v22  ;;  %2514 = vmatprep.mubr.msk.bf16.mxu0 %vm3256_vm0, %v3255_v1 }
 0x3ca   :  { %2500 = vmatprep.subr.bf16.mxu0 %v3255_v1 }
 0x3cd   :  { %2501 = vmatpush3.bf16.msra.mxu0 %v3397_v25 }
 0x3ce   :  { %2502 = vmatprep.subr.bf16.mxu0 %v3255_v1 }
 0x3d1   :  { %2503 = vmatpush3.bf16.msra.mxu0 %v3406_v26 }
 0x3d2   :  { %2504 = vmatprep.subr.bf16.mxu0 %v3255_v1 }
 0x3d5   :  { %2505 = vmatpush3.bf16.msra.mxu0 %v3410_v27 }
 0x3d6   :  { %2506 = vmatprep.subr.bf16.mxu0 %v3255_v1 }
 0x3d9   :  { %2507 = vmatpush3.bf16.msra.mxu0 %v3414_v28 }
 0x3da   :  { %2508 = vmatprep.subr.bf16.mxu0 %v3255_v1 }
 0x3dd   :  { %2509 = vmatpush3.bf16.msra.mxu0 %v3418_v29 }
 0x3de   :  { %2510 = vmatprep.subr.bf16.mxu0 %v3255_v1 }
 0x3e1   :  { %2511 = vmatpush3.bf16.msra.mxu0 %v3422_v30 }
 0x3e2   :  { %2512 = vmatprep.subr.bf16.mxu0 %v3255_v1 }
 0x3e5   :  { %2513 = vmatpush3.bf16.msra.mxu0 %v3426_v31 }
 0x3e6   :  { %2538 = vmatprep.subr.bf16.mxu0 %v3255_v1 }
 0x488   :  { %v802_v57 = vpop.f32.mrf.mxu0 }
 0x489   :  { %v803_v58 = vadd.f32 %v3525_v5, %v802_v57  ;;  %v990_v57 = vstv %s2027_s28 }
 0x48a   :  { %v2476_v59 = vpop.f32.mrf.mxu0 }
 0x48b   :  { %v808_v60 = vmax.f32 %v803_v58, 0.0 }
 0x48c   :  { %v805_v61 = vpop.f32.mrf.mxu0 }
 0x48d   :  { %v809_v62 = vpack.c.bf16 %v808_v60, %v808_v60 }
 0x48e   :  { %v2477_v63 = vpop.f32.mrf.mxu0 }
 0x48f   :  { %2495 = vmatmul.mubr.bf16.vlgmr.msra.gmra.mxu1 %v809_v62 }
 0x490   :  { %2519 = vmatpush3.bf16.msra.mxu1 %v3437_v34  ;;  %2534 = vmatprep.mubr.msk.bf16.mxu1 %vm3256_vm0, %v3255_v1 }
 0x491   :  { %2520 = vmatprep.subr.bf16.mxu1 %v3255_v1 }
 0x494   :  { %2521 = vmatpush3.bf16.msra.mxu1 %v3440_v35 }
 0x495   :  { %2522 = vmatprep.subr.bf16.mxu1 %v3255_v1 }
 0x498   :  { %2523 = vmatpush3.bf16.msra.mxu1 %v3444_v36 }
 0x499   :  { %2524 = vmatprep.subr.bf16.mxu1 %v3255_v1 }
 0x49c   :  { %2525 = vmatpush3.bf16.msra.mxu1 %v3448_v37 }
 0x49d   :  { %2526 = vmatprep.subr.bf16.mxu1 %v3255_v1 }
 0x4a0   :  { %2527 = vmatpush3.bf16.msra.mxu1 %v3452_v38 }
 0x4a1   :  { %2528 = vmatprep.subr.bf16.mxu1 %v3255_v1 }
 0x4a4   :  { %2529 = vmatpush3.bf16.msra.mxu1 %v3456_v39 }
 0x4a5   :  { %2530 = vmatprep.subr.bf16.mxu1 %v3255_v1 }
 0x4a8   :  { %2531 = vmatpush3.bf16.msra.mxu1 %v3461_v40 }
 0x4a9   :  { %2532 = vmatprep.subr.bf16.mxu1 %v3255_v1 }
 0x4ac   :  { %2533 = vmatpush3.bf16.msra.mxu1 %v3465_v41 }
 0x4ad   :  { %2558 = vmatprep.subr.bf16.mxu1 %v3255_v1 }
 0x54f   :  { %v844_v0 = vpop.f32.mrf.mxu1 }
 0x550   :  { %v845_v7 = vadd.f32 %v3549_v13, %v844_v0 }
 0x551   :  { %v2496_v8 = vpop.f32.mrf.mxu1 }
 0x552   :  { %v853_v10 = vmul.f32 %v852_v6, %v845_v7  ;;  %v2031_v6 = vld [vmem:[#allocation9 + $0x3] ss:$0 sm:$0xff] }
 0x553   :  { %v847_v11 = vpop.f32.mrf.mxu1 }
 0x554   :  { %v3615_v12 = vsub.f32 %v851_v9, %v853_v10 }
 0x555   :  { %v2497_v14 = vpop.f32.mrf.mxu1 }
 0x556   :  { %v858_v15 = vpack.c.bf16 %v3615_v12, %v3615_v12  ;;  %v989_v60 = vmul.f32 %v988_v55, %v3615_v12 }
 0x558   :  { %2515 = vmatmul.mubr.bf16.vlgmr.msra.gmra.mxu0 %v858_v15 }
 0x559   :  { %2539 = vmatpush3.bf16.msra.mxu0 %v3469_v42  ;;  %2554 = vmatprep.mubr.msk.bf16.mxu0 %vm3256_vm0, %v3255_v1 }
 0x55a   :  { %2540 = vmatprep.subr.bf16.mxu0 %v3255_v1 }
 0x55d   :  { %2541 = vmatpush3.bf16.msra.mxu0 %v3472_v43 }
 0x55e   :  { %2542 = vmatprep.subr.bf16.mxu0 %v3255_v1 }
 0x561   :  { %2543 = vmatpush3.bf16.msra.mxu0 %v3476_v44 }
 0x562   :  { %2544 = vmatprep.subr.bf16.mxu0 %v3255_v1 }
 0x565   :  { %2545 = vmatpush3.bf16.msra.mxu0 %v3480_v45 }
 0x566   :  { %2546 = vmatprep.subr.bf16.mxu0 %v3255_v1 }
 0x569   :  { %2547 = vmatpush3.bf16.msra.mxu0 %v3484_v46 }
 0x56a   :  { %2548 = vmatprep.subr.bf16.mxu0 %v3255_v1 }
 0x56d   :  { %2549 = vmatpush3.bf16.msra.mxu0 %v3488_v47 }
 0x56e   :  { %2550 = vmatprep.subr.bf16.mxu0 %v3255_v1 }
 0x571   :  { %2551 = vmatpush3.bf16.msra.mxu0 %v3514_v3 }
 0x572   :  { %2552 = vmatprep.subr.bf16.mxu0 %v3255_v1 }
 0x575   :  { %2553 = vmatpush3.bf16.msra.mxu0 %v3518_v4 }
 0x576   :  { %2578 = vmatprep.subr.bf16.mxu0 %v3255_v1 }
 0x618   :  { %v893_v17 = vpop.f32.mrf.mxu0 }
 0x619   :  { %v894_v18 = vadd.f32 %v893_v17, %v3493_v56 }
 0x61a   :  { %v2516_v19 = vpop.f32.mrf.mxu0 }
 0x61b   :  { %v903_v20 = vadd.f32 %v2028_v16, %v894_v18 }
 0x61c   :  { %v896_v21 = vpop.f32.mrf.mxu0 }
 0x61d   :  { %v904_v23 = vmax.f32 %v903_v20, 0.0 }
 0x61e   :  { %v2517_v24 = vpop.f32.mrf.mxu0 }
 0x61f   :  { %v905_v33 = vpack.c.bf16 %v904_v23, %v904_v23 }
 0x621   :  { %2535 = vmatmul.mubr.bf16.vlgmr.msra.gmra.mxu1 %v905_v33  ;;  %v1126_v33 = vstv %s2029_s29 }
 0x622   :  { %2559 = vmatpush3.bf16.msra.mxu1 %v3393_v22  ;;  %2574 = vmatprep.mubr.msk.bf16.mxu1 %vm3256_vm0, %v3255_v1 }
 0x623   :  { %2560 = vmatprep.subr.bf16.mxu1 %v3255_v1 }
 0x626   :  { %2561 = vmatpush3.bf16.msra.mxu1 %v3397_v25 }
 0x627   :  { %2562 = vmatprep.subr.bf16.mxu1 %v3255_v1 }
 0x62a   :  { %2563 = vmatpush3.bf16.msra.mxu1 %v3406_v26 }
 0x62b   :  { %2564 = vmatprep.subr.bf16.mxu1 %v3255_v1 }
 0x62e   :  { %2565 = vmatpush3.bf16.msra.mxu1 %v3410_v27 }
 0x62f   :  { %2566 = vmatprep.subr.bf16.mxu1 %v3255_v1 }
 0x632   :  { %2567 = vmatpush3.bf16.msra.mxu1 %v3414_v28 }
 0x633   :  { %2568 = vmatprep.subr.bf16.mxu1 %v3255_v1 }
 0x636   :  { %2569 = vmatpush3.bf16.msra.mxu1 %v3418_v29 }
 0x637   :  { %2570 = vmatprep.subr.bf16.mxu1 %v3255_v1 }
 0x63a   :  { %2571 = vmatpush3.bf16.msra.mxu1 %v3422_v30 }
 0x63b   :  { %2572 = vmatprep.subr.bf16.mxu1 %v3255_v1 }
 0x63e   :  { %2573 = vmatpush3.bf16.msra.mxu1 %v3426_v31 }
 0x63f   :  { %2598 = vmatprep.subr.bf16.mxu1 %v3255_v1 }
 0x6e1   :  { %v940_v32 = vpop.f32.mrf.mxu1 }
 0x6e2   :  { %v941_v48 = vadd.f32 %v3525_v5, %v940_v32  ;;  %v1128_v32 = vstv %s2030_s30 }
 0x6e3   :  { %v2536_v49 = vpop.f32.mrf.mxu1 }
 0x6e4   :  { %v946_v50 = vmax.f32 %v941_v48, 0.0 }
 0x6e5   :  { %v943_v51 = vpop.f32.mrf.mxu1 }
 0x6e6   :  { %v947_v52 = vpack.c.bf16 %v946_v50, %v946_v50 }
 0x6e7   :  { %v2537_v53 = vpop.f32.mrf.mxu1 }
 0x6e8   :  { %2555 = vmatmul.mubr.bf16.vlgmr.msra.gmra.mxu0 %v947_v52 }
 0x6e9   :  { %2579 = vmatpush3.bf16.msra.mxu0 %v3437_v34  ;;  %2594 = vmatprep.mubr.msk.bf16.mxu0 %vm3256_vm0, %v3255_v1 }
 0x6ea   :  { %2580 = vmatprep.subr.bf16.mxu0 %v3255_v1 }
 0x6ed   :  { %2581 = vmatpush3.bf16.msra.mxu0 %v3440_v35 }
 0x6ee   :  { %2582 = vmatprep.subr.bf16.mxu0 %v3255_v1 }
 0x6f1   :  { %2583 = vmatpush3.bf16.msra.mxu0 %v3444_v36 }
 0x6f2   :  { %2584 = vmatprep.subr.bf16.mxu0 %v3255_v1 }
 0x6f5   :  { %2585 = vmatpush3.bf16.msra.mxu0 %v3448_v37 }
 0x6f6   :  { %2586 = vmatprep.subr.bf16.mxu0 %v3255_v1 }
 0x6f9   :  { %2587 = vmatpush3.bf16.msra.mxu0 %v3452_v38 }
 0x6fa   :  { %2588 = vmatprep.subr.bf16.mxu0 %v3255_v1 }
 0x6fd   :  { %2589 = vmatpush3.bf16.msra.mxu0 %v3456_v39 }
 0x6fe   :  { %2590 = vmatprep.subr.bf16.mxu0 %v3255_v1 }
 0x701   :  { %2591 = vmatpush3.bf16.msra.mxu0 %v3461_v40 }
 0x702   :  { %2592 = vmatprep.subr.bf16.mxu0 %v3255_v1 }
 0x705   :  { %2593 = vmatpush3.bf16.msra.mxu0 %v3465_v41 }
 0x706   :  { %2618 = vmatprep.subr.bf16.mxu0 %v3255_v1 }
 0x7a8   :  { %v982_v54 = vpop.f32.mrf.mxu0 }
 0x7a9   :  { %v983_v58 = vadd.f32 %v3549_v13, %v982_v54 }
 0x7aa   :  { %v2556_v59 = vpop.f32.mrf.mxu0 }
 0x7ab   :  { %v991_v61 = vmul.f32 %v990_v57, %v983_v58  ;;  %v2034_v57 = vld [vmem:[#allocation9 + $0x4] ss:$0 sm:$0xff] }
 0x7ac   :  { %v985_v62 = vpop.f32.mrf.mxu0 }
 0x7ad   :  { %v3677_v63 = vsub.f32 %v989_v60, %v991_v61 }
 0x7ae   :  { %v2557_v0 = vpop.f32.mrf.mxu0 }
 0x7af   :  { %v996_v2 = vpack.c.bf16 %v3677_v63, %v3677_v63  ;;  %v1127_v50 = vmul.f32 %v1126_v33, %v3677_v63 }
 0x7b1   :  { %2575 = vmatmul.mubr.bf16.vlgmr.msra.gmra.mxu1 %v996_v2 }
 0x7b2   :  { %2599 = vmatpush3.bf16.msra.mxu1 %v3469_v42  ;;  %2614 = vmatprep.mubr.msk.bf16.mxu1 %vm3256_vm0, %v3255_v1 }
 0x7b3   :  { %2600 = vmatprep.subr.bf16.mxu1 %v3255_v1 }
 0x7b6   :  { %2601 = vmatpush3.bf16.msra.mxu1 %v3472_v43 }
 0x7b7   :  { %2602 = vmatprep.subr.bf16.mxu1 %v3255_v1 }
 0x7ba   :  { %2603 = vmatpush3.bf16.msra.mxu1 %v3476_v44 }
 0x7bb   :  { %2604 = vmatprep.subr.bf16.mxu1 %v3255_v1 }
 0x7be   :  { %2605 = vmatpush3.bf16.msra.mxu1 %v3480_v45 }
 0x7bf   :  { %2606 = vmatprep.subr.bf16.mxu1 %v3255_v1 }
 0x7c2   :  { %2607 = vmatpush3.bf16.msra.mxu1 %v3484_v46 }
 0x7c3   :  { %2608 = vmatprep.subr.bf16.mxu1 %v3255_v1 }
 0x7c6   :  { %2609 = vmatpush3.bf16.msra.mxu1 %v3488_v47 }
 0x7c7   :  { %2610 = vmatprep.subr.bf16.mxu1 %v3255_v1 }
 0x7ca   :  { %2611 = vmatpush3.bf16.msra.mxu1 %v3514_v3 }
 0x7cb   :  { %2612 = vmatprep.subr.bf16.mxu1 %v3255_v1 }
 0x7ce   :  { %2613 = vmatpush3.bf16.msra.mxu1 %v3518_v4 }
 0x7cf   :  { %2638 = vmatprep.subr.bf16.mxu1 %v3255_v1 }
 0x871   :  { %v1031_v7 = vpop.f32.mrf.mxu1 }
 0x872   :  { %v1032_v8 = vadd.f32 %v1031_v7, %v3493_v56 }
 0x873   :  { %v2576_v9 = vpop.f32.mrf.mxu1 }
 0x874   :  { %v1041_v10 = vadd.f32 %v2031_v6, %v1032_v8 }
 0x875   :  { %v1034_v11 = vpop.f32.mrf.mxu1 }
 0x876   :  { %v1042_v12 = vmax.f32 %v1041_v10, 0.0  ;;  %v1264_v11 = vstv %s2032_s15 }
 0x877   :  { %v2577_v14 = vpop.f32.mrf.mxu1 }
 0x878   :  { %v1043_v15 = vpack.c.bf16 %v1042_v12, %v1042_v12  ;;  %v1266_v12 = vstv %s2033_s16 }
 0x87a   :  { %2595 = vmatmul.mubr.bf16.vlgmr.msra.gmra.mxu0 %v1043_v15 }
 0x87b   :  { %2619 = vmatpush3.bf16.msra.mxu0 %v3393_v22  ;;  %2634 = vmatprep.mubr.msk.bf16.mxu0 %vm3256_vm0, %v3255_v1 }
 0x87c   :  { %2620 = vmatprep.subr.bf16.mxu0 %v3255_v1 }
 0x87f   :  { %2621 = vmatpush3.bf16.msra.mxu0 %v3397_v25 }
 0x880   :  { %2622 = vmatprep.subr.bf16.mxu0 %v3255_v1 }
 0x883   :  { %2623 = vmatpush3.bf16.msra.mxu0 %v3406_v26 }
 0x884   :  { %2624 = vmatprep.subr.bf16.mxu0 %v3255_v1 }
 0x887   :  { %2625 = vmatpush3.bf16.msra.mxu0 %v3410_v27 }
 0x888   :  { %2626 = vmatprep.subr.bf16.mxu0 %v3255_v1 }
 0x88b   :  { %2627 = vmatpush3.bf16.msra.mxu0 %v3414_v28 }
 0x88c   :  { %2628 = vmatprep.subr.bf16.mxu0 %v3255_v1 }
 0x88f   :  { %2629 = vmatpush3.bf16.msra.mxu0 %v3418_v29 }
 0x890   :  { %2630 = vmatprep.subr.bf16.mxu0 %v3255_v1 }
 0x893   :  { %2631 = vmatpush3.bf16.msra.mxu0 %v3422_v30 }
 0x894   :  { %2632 = vmatprep.subr.bf16.mxu0 %v3255_v1 }
 0x897   :  { %2633 = vmatpush3.bf16.msra.mxu0 %v3426_v31 }
 0x898   :  { %2658 = vmatprep.subr.bf16.mxu0 %v3255_v1 }
 0x93a   :  { %v1078_v16 = vpop.f32.mrf.mxu0 }
 0x93b   :  { %v1079_v17 = vadd.f32 %v3525_v5, %v1078_v16 }
 0x93c   :  { %v2596_v18 = vpop.f32.mrf.mxu0 }
 0x93d   :  { %v1084_v19 = vmax.f32 %v1079_v17, 0.0 }
 0x93e   :  { %v1081_v20 = vpop.f32.mrf.mxu0 }
 0x93f   :  { %v1085_v21 = vpack.c.bf16 %v1084_v19, %v1084_v19 }
 0x940   :  { %v2597_v23 = vpop.f32.mrf.mxu0 }
 0x941   :  { %2615 = vmatmul.mubr.bf16.vlgmr.msra.gmra.mxu1 %v1085_v21 }
 0x942   :  { %2639 = vmatpush3.bf16.msra.mxu1 %v3437_v34  ;;  %2654 = vmatprep.mubr.msk.bf16.mxu1 %vm3256_vm0, %v3255_v1 }
 0x943   :  { %2640 = vmatprep.subr.bf16.mxu1 %v3255_v1 }
 0x946   :  { %2641 = vmatpush3.bf16.msra.mxu1 %v3440_v35 }
 0x947   :  { %2642 = vmatprep.subr.bf16.mxu1 %v3255_v1 }
 0x94a   :  { %2643 = vmatpush3.bf16.msra.mxu1 %v3444_v36 }
 0x94b   :  { %2644 = vmatprep.subr.bf16.mxu1 %v3255_v1 }
 0x94e   :  { %2645 = vmatpush3.bf16.msra.mxu1 %v3448_v37 }
 0x94f   :  { %2646 = vmatprep.subr.bf16.mxu1 %v3255_v1 }
 0x952   :  { %2647 = vmatpush3.bf16.msra.mxu1 %v3452_v38 }
 0x953   :  { %2648 = vmatprep.subr.bf16.mxu1 %v3255_v1 }
 0x956   :  { %2649 = vmatpush3.bf16.msra.mxu1 %v3456_v39 }
 0x957   :  { %2650 = vmatprep.subr.bf16.mxu1 %v3255_v1 }
 0x95a   :  { %2651 = vmatpush3.bf16.msra.mxu1 %v3461_v40 }
 0x95b   :  { %2652 = vmatprep.subr.bf16.mxu1 %v3255_v1 }
 0x95e   :  { %2653 = vmatpush3.bf16.msra.mxu1 %v3465_v41 }
 0x95f   :  { %2678 = vmatprep.subr.bf16.mxu1 %v3255_v1 }
 0xa01   :  { %v1120_v24 = vpop.f32.mrf.mxu1 }
 0xa02   :  { %v1121_v48 = vadd.f32 %v3549_v13, %v1120_v24 }
 0xa03   :  { %v2616_v49 = vpop.f32.mrf.mxu1 }
 0xa04   :  { %v1129_v51 = vmul.f32 %v1128_v32, %v1121_v48  ;;  %v3824_v32 = vld [vmem:[#allocation15 + $0x38] sm:$0xff]   ;;  %v3830_v48 = vld [vmem:[#allocation15 + $0x30] sm:$0xff]   ;;  %v3834_v49 = vld [vmem:[#allocation15 + $0x28] sm:$0xff]  }
 0xa05   :  { %v1123_v52 = vpop.f32.mrf.mxu1 }
 0xa06   :  { %v3739_v53 = vsub.f32 %v1127_v50, %v1129_v51 }
 0xa07   :  { %v2617_v54 = vpop.f32.mrf.mxu1 }
 0xa08   :  { %v1134_v55 = vpack.c.bf16 %v3739_v53, %v3739_v53  ;;  %v1265_v16 = vmul.f32 %v1264_v11, %v3739_v53 }
 0xa0a   :  { %2635 = vmatmul.mubr.bf16.vlgmr.msra.gmra.mxu0 %v1134_v55  ;;  %v3873_v55 = vld [vmem:[#allocation18 + $0x38] sm:$0xff]  }
 0xa0b   :  { %2659 = vmatpush3.bf16.msra.mxu0 %v3469_v42  ;;  %2674 = vmatprep.mubr.msk.bf16.mxu0 %vm3256_vm0, %v3255_v1 }
 0xa0c   :  { %2660 = vmatprep.subr.bf16.mxu0 %v3255_v1 }
 0xa0f   :  { %2661 = vmatpush3.bf16.msra.mxu0 %v3472_v43 }
 0xa10   :  { %2662 = vmatprep.subr.bf16.mxu0 %v3255_v1 }
 0xa13   :  { %2663 = vmatpush3.bf16.msra.mxu0 %v3476_v44 }
 0xa14   :  { %2664 = vmatprep.subr.bf16.mxu0 %v3255_v1 }
 0xa17   :  { %2665 = vmatpush3.bf16.msra.mxu0 %v3480_v45 }
 0xa18   :  { %2666 = vmatprep.subr.bf16.mxu0 %v3255_v1 }
 0xa1b   :  { %2667 = vmatpush3.bf16.msra.mxu0 %v3484_v46 }
 0xa1c   :  { %2668 = vmatprep.subr.bf16.mxu0 %v3255_v1 }
 0xa1f   :  { %2669 = vmatpush3.bf16.msra.mxu0 %v3488_v47 }
 0xa20   :  { %2670 = vmatprep.subr.bf16.mxu0 %v3255_v1 }
 0xa23   :  { %2671 = vmatpush3.bf16.msra.mxu0 %v3514_v3 }
 0xa24   :  { %2672 = vmatprep.subr.bf16.mxu0 %v3255_v1 }
 0xa27   :  { %2673 = vmatpush3.bf16.msra.mxu0 %v3518_v4 }
 0xa28   :  { %2698 = vmatprep.subr.bf16.mxu0 %v3255_v1 }
 0xaca   :  { %v1169_v58 = vpop.f32.mrf.mxu0 }
 0xacb   :  { %v1170_v59 = vadd.f32 %v1169_v58, %v3493_v56  ;;  %v3883_v58 = vld [vmem:[#allocation18 + $0x28] sm:$0xff]  }
 0xacc   :  { %v2636_v60 = vpop.f32.mrf.mxu0 }
 0xacd   :  { %v1179_v61 = vadd.f32 %v2034_v57, %v1170_v59  ;;  %v3879_v57 = vld [vmem:[#allocation18 + $0x30] sm:$0xff]   ;;  %v3887_v59 = vld [vmem:[#allocation18 + $0x20] sm:$0xff]   ;;  %v3891_v60 = vld [vmem:[#allocation18 + $0x18] sm:$0xff]  }
 0xace   :  { %v1172_v62 = vpop.f32.mrf.mxu0 }
 0xacf   :  { %v1180_v63 = vmax.f32 %v1179_v61, 0.0  ;;  %v3895_v61 = vld [vmem:[#allocation18 + $0x10] sm:$0xff]  }
 0xad0   :  { %v2637_v0 = vpop.f32.mrf.mxu0  ;;  %v2040_v62 = vld [vmem:[#allocation9 + $0x6] ss:$0 sm:$0xff] }
 0xad1   :  { %v1181_v2 = vpack.c.bf16 %v1180_v63, %v1180_v63 }
 0xad3   :  { %2655 = vmatmul.mubr.bf16.vlgmr.msra.gmra.mxu1 %v1181_v2 }
 0xad4   :  { %2679 = vmatpush3.bf16.msra.mxu1 %v3393_v22  ;;  %2694 = vmatprep.mubr.msk.bf16.mxu1 %vm3256_vm0, %v3255_v1 }
 0xad5   :  { %2680 = vmatprep.subr.bf16.mxu1 %v3255_v1 }
 0xad8   :  { %2681 = vmatpush3.bf16.msra.mxu1 %v3397_v25 }
 0xad9   :  { %2682 = vmatprep.subr.bf16.mxu1 %v3255_v1 }
 0xadc   :  { %2683 = vmatpush3.bf16.msra.mxu1 %v3406_v26 }
 0xadd   :  { %2684 = vmatprep.subr.bf16.mxu1 %v3255_v1 }
 0xae0   :  { %2685 = vmatpush3.bf16.msra.mxu1 %v3410_v27 }
 0xae1   :  { %2686 = vmatprep.subr.bf16.mxu1 %v3255_v1 }
 0xae4   :  { %2687 = vmatpush3.bf16.msra.mxu1 %v3414_v28 }
 0xae5   :  { %2688 = vmatprep.subr.bf16.mxu1 %v3255_v1 }
 0xae8   :  { %2689 = vmatpush3.bf16.msra.mxu1 %v3418_v29 }
 0xae9   :  { %2690 = vmatprep.subr.bf16.mxu1 %v3255_v1 }
 0xaec   :  { %2691 = vmatpush3.bf16.msra.mxu1 %v3422_v30 }
 0xaed   :  { %2692 = vmatprep.subr.bf16.mxu1 %v3255_v1 }
 0xaf0   :  { %2693 = vmatpush3.bf16.msra.mxu1 %v3426_v31 }
 0xaf1   :  { %2718 = vmatprep.subr.bf16.mxu1 %v3255_v1 }
 0xb93   :  { %v1216_v22 = vpop.f32.mrf.mxu1 }
 0xb94   :  { %v1217_v25 = vadd.f32 %v3525_v5, %v1216_v22 }
 0xb95   :  { %v2656_v26 = vpop.f32.mrf.mxu1 }
 0xb96   :  { %v1222_v6 = vmax.f32 %v1217_v25, 0.0 }
 0xb97   :  { %v1219_v7 = vpop.f32.mrf.mxu1 }
 0xb98   :  { %v1223_v8 = vpack.c.bf16 %v1222_v6, %v1222_v6 }
 0xb99   :  { %v2657_v9 = vpop.f32.mrf.mxu1 }
 0xb9a   :  { %2675 = vmatmul.mubr.bf16.vlgmr.msra.gmra.mxu0 %v1223_v8  ;;  %v3920_v8 = vld [vmem:[#allocation15 + $0x10] sm:$0xff]   ;;  %v3924_v9 = vld [vmem:[#allocation15 + $0x8] sm:$0xff]  }
 0xb9b   :  { %2699 = vmatpush3.bf16.msra.mxu0 %v3437_v34  ;;  %2714 = vmatprep.mubr.msk.bf16.mxu0 %vm3256_vm0, %v3255_v1 }
 0xb9c   :  { %2700 = vmatprep.subr.bf16.mxu0 %v3255_v1 }
 0xb9f   :  { %2701 = vmatpush3.bf16.msra.mxu0 %v3440_v35 }
 0xba0   :  { %2702 = vmatprep.subr.bf16.mxu0 %v3255_v1 }
 0xba3   :  { %2703 = vmatpush3.bf16.msra.mxu0 %v3444_v36 }
 0xba4   :  { %2704 = vmatprep.subr.bf16.mxu0 %v3255_v1 }
 0xba7   :  { %2705 = vmatpush3.bf16.msra.mxu0 %v3448_v37 }
 0xba8   :  { %2706 = vmatprep.subr.bf16.mxu0 %v3255_v1 }
 0xbab   :  { %2707 = vmatpush3.bf16.msra.mxu0 %v3452_v38 }
 0xbac   :  { %2708 = vmatprep.subr.bf16.mxu0 %v3255_v1 }
 0xbaf   :  { %2709 = vmatpush3.bf16.msra.mxu0 %v3456_v39 }
 0xbb0   :  { %2710 = vmatprep.subr.bf16.mxu0 %v3255_v1 }
 0xbb3   :  { %2711 = vmatpush3.bf16.msra.mxu0 %v3461_v40 }
 0xbb4   :  { %2712 = vmatprep.subr.bf16.mxu0 %v3255_v1 }
 0xbb7   :  { %2713 = vmatpush3.bf16.msra.mxu0 %v3465_v41 }
 0xbb8   :  { %2738 = vmatprep.subr.bf16.mxu0 %v3255_v1 }
 0xc5a   :  { %v1258_v10 = vpop.f32.mrf.mxu0 }
 0xc5b   :  { %v1259_v14 = vadd.f32 %v3549_v13, %v1258_v10  ;;  %v3928_v10 = vld [vmem:[#allocation15] sm:$0xff]  }
 0xc5c   :  { %v2676_v15 = vpop.f32.mrf.mxu0 }
 0xc5d   :  { %v1267_v17 = vmul.f32 %v1266_v12, %v1259_v14 }
 0xc5e   :  { %v1261_v18 = vpop.f32.mrf.mxu0 }
 0xc5f   :  { %v3801_v19 = vsub.f32 %v1265_v16, %v1267_v17 }
 0xc60   :  { %v2677_v20 = vpop.f32.mrf.mxu0 }
 0xc61   :  { %v1272_v21 = vpack.c.bf16 %v3801_v19, %v3801_v19  ;;  %v3939_v20 = vld [vmem:[#allocation16 + $0x30] sm:$0xff]  }
 0xc63   :  { %2695 = vmatmul.mubr.bf16.vlgmr.msra.gmra.mxu1 %v1272_v21  ;;  %v3947_v21 = vld [vmem:[#allocation16 + $0x20] sm:$0xff]  }
 0xc64   :  { %2719 = vmatpush3.bf16.msra.mxu1 %v3469_v42  ;;  %2734 = vmatprep.mubr.msk.bf16.mxu1 %vm3256_vm0, %v3255_v1  ;;  %v2037_v42 = vld [vmem:[#allocation9 + $0x5] ss:$0 sm:$0xff] }
 0xc65   :  { %2720 = vmatprep.subr.bf16.mxu1 %v3255_v1 }
 0xc68   :  { %2721 = vmatpush3.bf16.msra.mxu1 %v3472_v43 }
 0xc69   :  { %2722 = vmatprep.subr.bf16.mxu1 %v3255_v1 }
 0xc6c   :  { %2723 = vmatpush3.bf16.msra.mxu1 %v3476_v44 }
 0xc6d   :  { %2724 = vmatprep.subr.bf16.mxu1 %v3255_v1 }
 0xc70   :  { %2725 = vmatpush3.bf16.msra.mxu1 %v3480_v45 }
 0xc71   :  { %2726 = vmatprep.subr.bf16.mxu1 %v3255_v1 }
 0xc74   :  { %2727 = vmatpush3.bf16.msra.mxu1 %v3484_v46 }
 0xc75   :  { %2728 = vmatprep.subr.bf16.mxu1 %v3255_v1 }
 0xc78   :  { %2729 = vmatpush3.bf16.msra.mxu1 %v3488_v47 }
 0xc79   :  { %2730 = vmatprep.subr.bf16.mxu1 %v3255_v1 }
 0xc7c   :  { %2731 = vmatpush3.bf16.msra.mxu1 %v3514_v3 }
 0xc7d   :  { %2732 = vmatprep.subr.bf16.mxu1 %v3255_v1 }
 0xc80   :  { %2733 = vmatpush3.bf16.msra.mxu1 %v3518_v4 }
 0xc81   :  { %2758 = vmatprep.subr.bf16.mxu1 %v3255_v1 }
 0xd23   :  { %v1307_v43 = vpop.f32.mrf.mxu1 }
 0xd24   :  { %v1308_v44 = vadd.f32 %v1307_v43, %v3493_v56  ;;  %v3955_v43 = vld [vmem:[#allocation16 + $0x10] sm:$0xff]  }
 0xd25   :  { %v2696_v45 = vpop.f32.mrf.mxu1 }
 0xd26   :  { %v1317_v46 = vadd.f32 %v2037_v42, %v1308_v44  ;;  %v3951_v42 = vld [vmem:[#allocation16 + $0x18] sm:$0xff]   ;;  %v3959_v44 = vld [vmem:[#allocation16 + $0x8] sm:$0xff]   ;;  %v3963_v45 = vld [vmem:[#allocation16] sm:$0xff]  }
 0xd27   :  { %v1310_v23 = vpop.f32.mrf.mxu1 }
 0xd28   :  { %v1318_v24 = vmax.f32 %v1317_v46, 0.0  ;;  %v1540_v23 = vstv %s2038_s1 }
 0xd29   :  { %v2697_v33 = vpop.f32.mrf.mxu1 }
 0xd2a   :  { %v1319_v47 = vpack.c.bf16 %v1318_v24, %v1318_v24  ;;  %v1542_v24 = vstv %s2039_s18 }
 0xd2c   :  { %2715 = vmatmul.mubr.bf16.vlgmr.msra.gmra.mxu0 %v1319_v47 }
 0xd2d   :  { %2739 = vmatpush3.bf16.msra.mxu0 %v3824_v32  ;;  %2754 = vmatprep.mubr.msk.bf16.mxu0 %vm3256_vm0, %v3255_v1 }
 0xd2e   :  { %2740 = vmatprep.subr.bf16.mxu0 %v3255_v1 }
 0xd31   :  { %2741 = vmatpush3.bf16.msra.mxu0 %v3830_v48 }
 0xd32   :  { %2742 = vmatprep.subr.bf16.mxu0 %v3255_v1 }
 0xd35   :  { %2743 = vmatpush3.bf16.msra.mxu0 %v3834_v49 }
 0xd36   :  { %2744 = vmatprep.subr.bf16.mxu0 %v3255_v1 }
 0xd39   :  { %2745 = vmatpush3.bf16.msra.mxu0 %v3410_v27 }
 0xd3a   :  { %2746 = vmatprep.subr.bf16.mxu0 %v3255_v1 }
 0xd3d   :  { %2747 = vmatpush3.bf16.msra.mxu0 %v3414_v28 }
 0xd3e   :  { %2748 = vmatprep.subr.bf16.mxu0 %v3255_v1 }
 0xd41   :  { %2749 = vmatpush3.bf16.msra.mxu0 %v3418_v29 }
 0xd42   :  { %2750 = vmatprep.subr.bf16.mxu0 %v3255_v1 }
 0xd45   :  { %2751 = vmatpush3.bf16.msra.mxu0 %v3422_v30  ;;  %v1402_v30 = vstv %s2035_s3 }
 0xd46   :  { %2752 = vmatprep.subr.bf16.mxu0 %v3255_v1 }
 0xd49   :  { %2753 = vmatpush3.bf16.msra.mxu0 %v3426_v31  ;;  %v1404_v31 = vstv %s2036_s17 }
 0xd4a   :  { %2778 = vmatprep.subr.bf16.mxu0 %v3255_v1 }
 0xdec   :  { %v1354_v50 = vpop.f32.mrf.mxu0 }
 0xded   :  { %v1355_v27 = vadd.f32 %v3525_v5, %v1354_v50 }
 0xdee   :  { %v2716_v51 = vpop.f32.mrf.mxu0 }
 0xdef   :  { %v1360_v52 = vmax.f32 %v1355_v27, 0.0 }
 0xdf0   :  { %v1357_v28 = vpop.f32.mrf.mxu0 }
 0xdf1   :  { %v1361_v53 = vpack.c.bf16 %v1360_v52, %v1360_v52 }
 0xdf2   :  { %v2717_v54 = vpop.f32.mrf.mxu0 }
 0xdf3   :  { %2735 = vmatmul.mubr.bf16.vlgmr.msra.gmra.mxu1 %v1361_v53  ;;  %v3991_v54 = vld [vmem:[#allocation18] sm:$0xff]  }
 0xdf4   :  { %2759 = vmatpush3.bf16.msra.mxu1 %v3437_v34  ;;  %2774 = vmatprep.mubr.msk.bf16.mxu1 %vm3256_vm0, %v3255_v1 }
 0xdf5   :  { %2760 = vmatprep.subr.bf16.mxu1 %v3255_v1 }
 0xdf8   :  { %2761 = vmatpush3.bf16.msra.mxu1 %v3440_v35 }
 0xdf9   :  { %2762 = vmatprep.subr.bf16.mxu1 %v3255_v1 }
 0xdfc   :  { %2763 = vmatpush3.bf16.msra.mxu1 %v3444_v36  ;;  %v1403_v36 = vmul.f32 %v1402_v30, %v3801_v19  ;;  %v3933_v19 = vld [vmem:[#allocation16 + $0x38] sm:$0xff]  }
 0xdfd   :  { %2764 = vmatprep.subr.bf16.mxu1 %v3255_v1 }
 0xe00   :  { %2765 = vmatpush3.bf16.msra.mxu1 %v3448_v37 }
 0xe01   :  { %2766 = vmatprep.subr.bf16.mxu1 %v3255_v1 }
 0xe04   :  { %2767 = vmatpush3.bf16.msra.mxu1 %v3452_v38 }
 0xe05   :  { %2768 = vmatprep.subr.bf16.mxu1 %v3255_v1 }
 0xe08   :  { %2769 = vmatpush3.bf16.msra.mxu1 %v3456_v39 }
 0xe09   :  { %2770 = vmatprep.subr.bf16.mxu1 %v3255_v1 }
 0xe0c   :  { %2771 = vmatpush3.bf16.msra.mxu1 %v3461_v40 }
 0xe0d   :  { %2772 = vmatprep.subr.bf16.mxu1 %v3255_v1 }
 0xe10   :  { %2773 = vmatpush3.bf16.msra.mxu1 %v3465_v41 }
 0xe11   :  { %2798 = vmatprep.subr.bf16.mxu1 %v3255_v1 }
 0xeb3   :  { %v1396_v29 = vpop.f32.mrf.mxu1 }
 0xeb4   :  { %v1397_v34 = vadd.f32 %v3549_v13, %v1396_v29  ;;  %v2043_v29 = vld [vmem:[#allocation9 + $0x7] ss:$0 sm:$0xff] }
 0xeb5   :  { %v2736_v35 = vpop.f32.mrf.mxu1 }
 0xeb6   :  { %v1405_v37 = vmul.f32 %v1404_v31, %v1397_v34 }
 0xeb7   :  { %v1399_v38 = vpop.f32.mrf.mxu1 }
 0xeb8   :  { %v3869_v39 = vsub.f32 %v1403_v36, %v1405_v37 }
 0xeb9   :  { %v2737_v40 = vpop.f32.mrf.mxu1 }
 0xeba   :  { %v1410_v41 = vpack.c.bf16 %v3869_v39, %v3869_v39  ;;  %v1541_v50 = vmul.f32 %v1540_v23, %v3869_v39 }
 0xebc   :  { %2755 = vmatmul.mubr.bf16.vlgmr.msra.gmra.mxu0 %v1410_v41  ;;  %v4017_v41 = vld [vmem:[%s4138_s9] ss:$0 sm:$0xff]  ;;  %s2041_s9 = sld [smem:[#allocation5 + $0x1c]] }
 0xebd   :  { %2779 = vmatpush3.bf16.msra.mxu0 %v3873_v55  ;;  %2794 = vmatprep.mubr.msk.bf16.mxu0 %vm3256_vm0, %v3255_v1 }
 0xebe   :  { %2780 = vmatprep.subr.bf16.mxu0 %v3255_v1 }
 0xec1   :  { %2781 = vmatpush3.bf16.msra.mxu0 %v3879_v57 }
 0xec2   :  { %2782 = vmatprep.subr.bf16.mxu0 %v3255_v1 }
 0xec5   :  { %2783 = vmatpush3.bf16.msra.mxu0 %v3883_v58 }
 0xec6   :  { %2784 = vmatprep.subr.bf16.mxu0 %v3255_v1 }
 0xec9   :  { %2785 = vmatpush3.bf16.msra.mxu0 %v3887_v59 }
 0xeca   :  { %2786 = vmatprep.subr.bf16.mxu0 %v3255_v1 }
 0xecd   :  { %2787 = vmatpush3.bf16.msra.mxu0 %v3891_v60 }
 0xece   :  { %2788 = vmatprep.subr.bf16.mxu0 %v3255_v1 }
 0xed1   :  { %2789 = vmatpush3.bf16.msra.mxu0 %v3895_v61 }
 0xed2   :  { %2790 = vmatprep.subr.bf16.mxu0 %v3255_v1 }
 0xed5   :  { %2791 = vmatpush3.bf16.msra.mxu0 %v3514_v3  ;;  %v3912_v3 = vld [vmem:[#allocation15 + $0x20] sm:$0xff]  }
 0xed6   :  { %2792 = vmatprep.subr.bf16.mxu0 %v3255_v1 }
 0xed9   :  { %2793 = vmatpush3.bf16.msra.mxu0 %v3518_v4  ;;  %v3916_v4 = vld [vmem:[#allocation15 + $0x18] sm:$0xff]  }
 0xeda   :  { %2818 = vmatprep.subr.bf16.mxu0 %v3255_v1 }
 0xf7c   :  { %v1445_v63 = vpop.f32.mrf.mxu0 }
 0xf7d   :  { %v1446_v0 = vadd.f32 %v1445_v63, %v3493_v56 }
 0xf7e   :  { %v2756_v2 = vpop.f32.mrf.mxu0 }
 0xf7f   :  { %v1455_v22 = vadd.f32 %v2040_v62, %v1446_v0 }
 0xf80   :  { %v1448_v25 = vpop.f32.mrf.mxu0 }
 0xf81   :  { %v1456_v26 = vmax.f32 %v1455_v22, 0.0 }
 0xf82   :  { %v2757_v6 = vpop.f32.mrf.mxu0 }
 0xf83   :  { %v1457_v7 = vpack.c.bf16 %v1456_v26, %v1456_v26  ;;  %v1678_v6 = vstv %s2041_s9 }
 0xf85   :  { %2775 = vmatmul.mubr.bf16.vlgmr.msra.gmra.mxu1 %v1457_v7  ;;  %v1680_v7 = vstv %s2042_s21 }
 0xf86   :  { %2799 = vmatpush3.bf16.msra.mxu1 %v3824_v32  ;;  %2814 = vmatprep.mubr.msk.bf16.mxu1 %vm3256_vm0, %v3255_v1 }
 0xf87   :  { %2800 = vmatprep.subr.bf16.mxu1 %v3255_v1 }
 0xf8a   :  { %2801 = vmatpush3.bf16.msra.mxu1 %v3830_v48 }
 0xf8b   :  { %2802 = vmatprep.subr.bf16.mxu1 %v3255_v1 }
 0xf8e   :  { %2803 = vmatpush3.bf16.msra.mxu1 %v3834_v49 }
 0xf8f   :  { %2804 = vmatprep.subr.bf16.mxu1 %v3255_v1 }
 0xf92   :  { %2805 = vmatpush3.bf16.msra.mxu1 %v3912_v3 }
 0xf93   :  { %2806 = vmatprep.subr.bf16.mxu1 %v3255_v1 }
 0xf96   :  { %2807 = vmatpush3.bf16.msra.mxu1 %v3916_v4 }
 0xf97   :  { %2808 = vmatprep.subr.bf16.mxu1 %v3255_v1 }
 0xf9a   :  { %2809 = vmatpush3.bf16.msra.mxu1 %v3920_v8 }
 0xf9b   :  { %2810 = vmatprep.subr.bf16.mxu1 %v3255_v1 }
 0xf9e   :  { %2811 = vmatpush3.bf16.msra.mxu1 %v3924_v9 }
 0xf9f   :  { %2812 = vmatprep.subr.bf16.mxu1 %v3255_v1 }
 0xfa2   :  { %2813 = vmatpush3.bf16.msra.mxu1 %v3928_v10 }
 0xfa3   :  { %2838 = vmatprep.subr.bf16.mxu1 %v3255_v1 }
0x1045   :  { %v1492_v11 = vpop.f32.mrf.mxu1 }
0x1046   :  { %v1493_v12 = vadd.f32 %v3525_v5, %v1492_v11  ;;  %v3943_v5 = vld [vmem:[#allocation16 + $0x28] sm:$0xff]  }
0x1047   :  { %v2776_v14 = vpop.f32.mrf.mxu1  ;;  %v4041_v11 = vld [vmem:[%s4140_s11] ss:$0 sm:$0xff]  ;;  %s2044_s11 = sld [smem:[#allocation5 + $0x20]] }
0x1048   :  { %v1498_v15 = vmax.f32 %v1493_v12, 0.0 }
0x1049   :  { %v1495_v16 = vpop.f32.mrf.mxu1 }
0x104a   :  { %v1499_v17 = vpack.c.bf16 %v1498_v15, %v1498_v15 }
0x104b   :  { %v2777_v18 = vpop.f32.mrf.mxu1 }
0x104c   :  { %2795 = vmatmul.mubr.bf16.vlgmr.msra.gmra.mxu0 %v1499_v17 }
0x104d   :  { %2819 = vmatpush3.bf16.msra.mxu0 %v3933_v19  ;;  %2834 = vmatprep.mubr.msk.bf16.mxu0 %vm3256_vm0, %v3255_v1 }
0x104e   :  { %2820 = vmatprep.subr.bf16.mxu0 %v3255_v1 }
0x1051   :  { %2821 = vmatpush3.bf16.msra.mxu0 %v3939_v20 }
0x1052   :  { %2822 = vmatprep.subr.bf16.mxu0 %v3255_v1 }
0x1055   :  { %2823 = vmatpush3.bf16.msra.mxu0 %v3943_v5 }
0x1056   :  { %2824 = vmatprep.subr.bf16.mxu0 %v3255_v1 }
0x1059   :  { %2825 = vmatpush3.bf16.msra.mxu0 %v3947_v21 }
0x105a   :  { %2826 = vmatprep.subr.bf16.mxu0 %v3255_v1 }
0x105d   :  { %2827 = vmatpush3.bf16.msra.mxu0 %v3951_v42 }
0x105e   :  { %2828 = vmatprep.subr.bf16.mxu0 %v3255_v1 }
0x1061   :  { %2829 = vmatpush3.bf16.msra.mxu0 %v3955_v43 }
0x1062   :  { %2830 = vmatprep.subr.bf16.mxu0 %v3255_v1 }
0x1065   :  { %2831 = vmatpush3.bf16.msra.mxu0 %v3959_v44 }
0x1066   :  { %2832 = vmatprep.subr.bf16.mxu0 %v3255_v1 }
0x1069   :  { %2833 = vmatpush3.bf16.msra.mxu0 %v3963_v45 }
0x106a   :  { %2858 = vmatprep.subr.bf16.mxu0 %v3255_v1 }
0x110c   :  { %v1534_v46 = vpop.f32.mrf.mxu0 }
0x110d   :  { %v1535_v33 = vadd.f32 %v3549_v13, %v1534_v46  ;;  %v3987_v13 = vld [vmem:[#allocation18 + $0x8] sm:$0xff]  }
0x110e   :  { %v2796_v47 = vpop.f32.mrf.mxu0 }
0x110f   :  { %v1543_v27 = vmul.f32 %v1542_v24, %v1535_v33  ;;  %v2046_v24 = vld [vmem:[#allocation9 + $0x8] ss:$0 sm:$0xff] }
0x1110   :  { %v1537_v51 = vpop.f32.mrf.mxu0 }
0x1111   :  { %v3969_v52 = vsub.f32 %v1541_v50, %v1543_v27 }
0x1112   :  { %v2797_v28 = vpop.f32.mrf.mxu0 }
0x1113   :  { %v1548_v53 = vpack.c.bf16 %v3969_v52, %v3969_v52  ;;  %v1679_v15 = vmul.f32 %v1678_v6, %v3969_v52 }
0x1115   :  { %2815 = vmatmul.mubr.bf16.vlgmr.msra.gmra.mxu1 %v1548_v53 }
0x1116   :  { %2839 = vmatpush3.bf16.msra.mxu1 %v3873_v55  ;;  %2854 = vmatprep.mubr.msk.bf16.mxu1 %vm3256_vm0, %v3255_v1 }
0x1117   :  { %2840 = vmatprep.subr.bf16.mxu1 %v3255_v1 }
0x111a   :  { %2841 = vmatpush3.bf16.msra.mxu1 %v3879_v57 }
0x111b   :  { %2842 = vmatprep.subr.bf16.mxu1 %v3255_v1 }
0x111e   :  { %2843 = vmatpush3.bf16.msra.mxu1 %v3883_v58 }
0x111f   :  { %2844 = vmatprep.subr.bf16.mxu1 %v3255_v1 }
0x1122   :  { %2845 = vmatpush3.bf16.msra.mxu1 %v3887_v59 }
0x1123   :  { %2846 = vmatprep.subr.bf16.mxu1 %v3255_v1 }
0x1126   :  { %2847 = vmatpush3.bf16.msra.mxu1 %v3891_v60 }
0x1127   :  { %2848 = vmatprep.subr.bf16.mxu1 %v3255_v1 }
0x112a   :  { %2849 = vmatpush3.bf16.msra.mxu1 %v3895_v61 }
0x112b   :  { %2850 = vmatprep.subr.bf16.mxu1 %v3255_v1 }
0x112e   :  { %2851 = vmatpush3.bf16.msra.mxu1 %v3987_v13 }
0x112f   :  { %2852 = vmatprep.subr.bf16.mxu1 %v3255_v1 }
0x1132   :  { %2853 = vmatpush3.bf16.msra.mxu1 %v3991_v54 }
0x1133   :  { %2878 = vmatprep.subr.bf16.mxu1 %v3255_v1 }
0x11d5   :  { %v1583_v30 = vpop.f32.mrf.mxu1 }
0x11d6   :  { %v1584_v31 = vadd.f32 %v1583_v30, %v3493_v56 }
0x11d7   :  { %v2816_v34 = vpop.f32.mrf.mxu1 }
0x11d8   :  { %v1593_v35 = vadd.f32 %v2043_v29, %v1584_v31 }
0x11d9   :  { %v1586_v36 = vpop.f32.mrf.mxu1 }
0x11da   :  { %v1594_v37 = vmax.f32 %v1593_v35, 0.0 }
0x11db   :  { %v2817_v38 = vpop.f32.mrf.mxu1 }
0x11dc   :  { %v1595_v39 = vpack.c.bf16 %v1594_v37, %v1594_v37 }
0x11de   :  { %2835 = vmatmul.mubr.bf16.vlgmr.msra.gmra.mxu0 %v1595_v39 }
0x11df   :  { %2859 = vmatpush3.bf16.msra.mxu0 %v3824_v32  ;;  %2874 = vmatprep.mubr.msk.bf16.mxu0 %vm3256_vm0, %v3255_v1 }
0x11e0   :  { %2860 = vmatprep.subr.bf16.mxu0 %v3255_v1 }
0x11e3   :  { %2861 = vmatpush3.bf16.msra.mxu0 %v3830_v48 }
0x11e4   :  { %2862 = vmatprep.subr.bf16.mxu0 %v3255_v1 }
0x11e7   :  { %2863 = vmatpush3.bf16.msra.mxu0 %v3834_v49 }
0x11e8   :  { %2864 = vmatprep.subr.bf16.mxu0 %v3255_v1 }
0x11eb   :  { %2865 = vmatpush3.bf16.msra.mxu0 %v3912_v3 }
0x11ec   :  { %2866 = vmatprep.subr.bf16.mxu0 %v3255_v1 }
0x11ef   :  { %2867 = vmatpush3.bf16.msra.mxu0 %v3916_v4 }
0x11f0   :  { %2868 = vmatprep.subr.bf16.mxu0 %v3255_v1 }
0x11f3   :  { %2869 = vmatpush3.bf16.msra.mxu0 %v3920_v8 }
0x11f4   :  { %2870 = vmatprep.subr.bf16.mxu0 %v3255_v1 }
0x11f7   :  { %2871 = vmatpush3.bf16.msra.mxu0 %v3924_v9 }
0x11f8   :  { %2872 = vmatprep.subr.bf16.mxu0 %v3255_v1 }
0x11fb   :  { %2873 = vmatpush3.bf16.msra.mxu0 %v3928_v10 }
0x11fc   :  { %2898 = vmatprep.subr.bf16.mxu0 %v3255_v1 }
0x129e   :  { %v1630_v40 = vpop.f32.mrf.mxu0 }
0x129f   :  { %v1631_v62 = vadd.f32 %v4017_v41, %v1630_v40 }
0x12a0   :  { %v2836_v63 = vpop.f32.mrf.mxu0 }
0x12a1   :  { %v1636_v0 = vmax.f32 %v1631_v62, 0.0  ;;  %v1954_v62 = vstv %s2047_s7 }
0x12a2   :  { %v1633_v2 = vpop.f32.mrf.mxu0 }
0x12a3   :  { %v1637_v22 = vpack.c.bf16 %v1636_v0, %v1636_v0 }
0x12a4   :  { %v2837_v25 = vpop.f32.mrf.mxu0 }
0x12a5   :  { %2855 = vmatmul.mubr.bf16.vlgmr.msra.gmra.mxu1 %v1637_v22 }
0x12a6   :  { %2879 = vmatpush3.bf16.msra.mxu1 %v3933_v19  ;;  %2894 = vmatprep.mubr.msk.bf16.mxu1 %vm3256_vm0, %v3255_v1 }
0x12a7   :  { %2880 = vmatprep.subr.bf16.mxu1 %v3255_v1 }
0x12aa   :  { %2881 = vmatpush3.bf16.msra.mxu1 %v3939_v20 }
0x12ab   :  { %2882 = vmatprep.subr.bf16.mxu1 %v3255_v1 }
0x12ae   :  { %2883 = vmatpush3.bf16.msra.mxu1 %v3943_v5 }
0x12af   :  { %2884 = vmatprep.subr.bf16.mxu1 %v3255_v1 }
0x12b2   :  { %2885 = vmatpush3.bf16.msra.mxu1 %v3947_v21 }
0x12b3   :  { %2886 = vmatprep.subr.bf16.mxu1 %v3255_v1 }
0x12b6   :  { %2887 = vmatpush3.bf16.msra.mxu1 %v3951_v42 }
0x12b7   :  { %2888 = vmatprep.subr.bf16.mxu1 %v3255_v1 }
0x12ba   :  { %2889 = vmatpush3.bf16.msra.mxu1 %v3955_v43 }
0x12bb   :  { %2890 = vmatprep.subr.bf16.mxu1 %v3255_v1 }
0x12be   :  { %2891 = vmatpush3.bf16.msra.mxu1 %v3959_v44 }
0x12bf   :  { %2892 = vmatprep.subr.bf16.mxu1 %v3255_v1 }
0x12c2   :  { %2893 = vmatpush3.bf16.msra.mxu1 %v3963_v45 }
0x12c3   :  { %2918 = vmatprep.subr.bf16.mxu1 %v3255_v1 }
0x1365   :  { %v1672_v26 = vpop.f32.mrf.mxu1 }
0x1366   :  { %v1673_v12 = vadd.f32 %v4041_v11, %v1672_v26 }
0x1367   :  { %v2856_v14 = vpop.f32.mrf.mxu1 }
0x1368   :  { %v1681_v16 = vmul.f32 %v1680_v7, %v1673_v12 }
0x1369   :  { %v1675_v17 = vpop.f32.mrf.mxu1 }
0x136a   :  { %v4045_v18 = vsub.f32 %v1679_v15, %v1681_v16 }
0x136b   :  { %v2857_v46 = vpop.f32.mrf.mxu1 }
0x136c   :  { %v1686_v23 = vpack.c.bf16 %v4045_v18, %v4045_v18 }
0x136e   :  { %2875 = vmatmul.mubr.bf16.vlgmr.msra.gmra.mxu0 %v1686_v23 }
0x136f   :  { %2899 = vmatpush3.bf16.msra.mxu0 %v3873_v55  ;;  %2914 = vmatprep.mubr.msk.bf16.mxu0 %vm3256_vm0, %v3255_v1 }
0x1370   :  { %2900 = vmatprep.subr.bf16.mxu0 %v3255_v1 }
0x1373   :  { %2901 = vmatpush3.bf16.msra.mxu0 %v3879_v57 }
0x1374   :  { %2902 = vmatprep.subr.bf16.mxu0 %v3255_v1 }
0x1377   :  { %2903 = vmatpush3.bf16.msra.mxu0 %v3883_v58 }
0x1378   :  { %2904 = vmatprep.subr.bf16.mxu0 %v3255_v1 }
0x137b   :  { %2905 = vmatpush3.bf16.msra.mxu0 %v3887_v59 }
0x137c   :  { %2906 = vmatprep.subr.bf16.mxu0 %v3255_v1 }
0x137f   :  { %2907 = vmatpush3.bf16.msra.mxu0 %v3891_v60 }
0x1380   :  { %2908 = vmatprep.subr.bf16.mxu0 %v3255_v1 }
0x1383   :  { %2909 = vmatpush3.bf16.msra.mxu0 %v3895_v61 }
0x1384   :  { %2910 = vmatprep.subr.bf16.mxu0 %v3255_v1 }
0x1387   :  { %2911 = vmatpush3.bf16.msra.mxu0 %v3987_v13 }
0x1388   :  { %2912 = vmatprep.subr.bf16.mxu0 %v3255_v1 }
0x138b   :  { %2913 = vmatpush3.bf16.msra.mxu0 %v3991_v54 }
0x138c   :  { %2938 = vmatprep.subr.bf16.mxu0 %v3255_v1 }
0x142e   :  { %v1721_v33 = vpop.f32.mrf.mxu0 }
0x142f   :  { %v1722_v47 = vadd.f32 %v1721_v33, %v3493_v56 }
0x1430   :  { %v2876_v50 = vpop.f32.mrf.mxu0 }
0x1431   :  { %v1731_v27 = vadd.f32 %v2046_v24, %v1722_v47 }
0x1432   :  { %v1724_v51 = vpop.f32.mrf.mxu0 }
0x1433   :  { %v1732_v52 = vmax.f32 %v1731_v27, 0.0 }
0x1434   :  { %v2877_v28 = vpop.f32.mrf.mxu0 }
0x1435   :  { %v1733_v53 = vpack.c.bf16 %v1732_v52, %v1732_v52 }
0x1437   :  { %2895 = vmatmul.mubr.bf16.vlgmr.msra.gmra.mxu1 %v1733_v53 }
0x1438   :  { %2919 = vmatpush3.bf16.msra.mxu1 %v3824_v32  ;;  %2934 = vmatprep.mubr.msk.bf16.mxu1 %vm3256_vm0, %v3255_v1 }
0x1439   :  { %2920 = vmatprep.subr.bf16.mxu1 %v3255_v1 }
0x143c   :  { %2921 = vmatpush3.bf16.msra.mxu1 %v3830_v48 }
0x143d   :  { %2922 = vmatprep.subr.bf16.mxu1 %v3255_v1 }
0x1440   :  { %2923 = vmatpush3.bf16.msra.mxu1 %v3834_v49 }
0x1441   :  { %2924 = vmatprep.subr.bf16.mxu1 %v3255_v1 }
0x1444   :  { %2925 = vmatpush3.bf16.msra.mxu1 %v3912_v3 }
0x1445   :  { %2926 = vmatprep.subr.bf16.mxu1 %v3255_v1 }
0x1448   :  { %2927 = vmatpush3.bf16.msra.mxu1 %v3916_v4 }
0x1449   :  { %2928 = vmatprep.subr.bf16.mxu1 %v3255_v1 }
0x144c   :  { %2929 = vmatpush3.bf16.msra.mxu1 %v3920_v8 }
0x144d   :  { %2930 = vmatprep.subr.bf16.mxu1 %v3255_v1 }
0x1450   :  { %2931 = vmatpush3.bf16.msra.mxu1 %v3924_v9  ;;  %v1816_v9 = vstv %s2044_s11 }
0x1451   :  { %2932 = vmatprep.subr.bf16.mxu1 %v3255_v1 }
0x1454   :  { %2933 = vmatpush3.bf16.msra.mxu1 %v3928_v10  ;;  %v1818_v10 = vstv %s2045_s0 }
0x1455   :  { %2958 = vmatprep.subr.bf16.mxu1 %v3255_v1 }
0x14f7   :  { %v1768_v32 = vpop.f32.mrf.mxu1 }
0x14f8   :  { %v1769_v48 = vadd.f32 %v4017_v41, %v1768_v32 }
0x14f9   :  { %v2896_v49 = vpop.f32.mrf.mxu1 }
0x14fa   :  { %v1774_v3 = vmax.f32 %v1769_v48, 0.0 }
0x14fb   :  { %v1771_v4 = vpop.f32.mrf.mxu1 }
0x14fc   :  { %v1775_v29 = vpack.c.bf16 %v1774_v3, %v1774_v3 }
0x14fd   :  { %v2897_v30 = vpop.f32.mrf.mxu1 }
0x14fe   :  { %2915 = vmatmul.mubr.bf16.vlgmr.msra.gmra.mxu0 %v1775_v29 }
0x14ff   :  { %2939 = vmatpush3.bf16.msra.mxu0 %v3933_v19  ;;  %2954 = vmatprep.mubr.msk.bf16.mxu0 %vm3256_vm0, %v3255_v1 }
0x1500   :  { %2940 = vmatprep.subr.bf16.mxu0 %v3255_v1 }
0x1503   :  { %2941 = vmatpush3.bf16.msra.mxu0 %v3939_v20 }
0x1504   :  { %2942 = vmatprep.subr.bf16.mxu0 %v3255_v1 }
0x1507   :  { %2943 = vmatpush3.bf16.msra.mxu0 %v3943_v5  ;;  %v1817_v5 = vmul.f32 %v1816_v9, %v4045_v18 }
0x1508   :  { %2944 = vmatprep.subr.bf16.mxu0 %v3255_v1 }
0x150b   :  { %2945 = vmatpush3.bf16.msra.mxu0 %v3947_v21 }
0x150c   :  { %2946 = vmatprep.subr.bf16.mxu0 %v3255_v1 }
0x150f   :  { %2947 = vmatpush3.bf16.msra.mxu0 %v3951_v42 }
0x1510   :  { %2948 = vmatprep.subr.bf16.mxu0 %v3255_v1 }
0x1513   :  { %2949 = vmatpush3.bf16.msra.mxu0 %v3955_v43 }
0x1514   :  { %2950 = vmatprep.subr.bf16.mxu0 %v3255_v1 }
0x1517   :  { %2951 = vmatpush3.bf16.msra.mxu0 %v3959_v44 }
0x1518   :  { %2952 = vmatprep.subr.bf16.mxu0 %v3255_v1 }
0x151b   :  { %2953 = vmatpush3.bf16.msra.mxu0 %v3963_v45 }
0x15be   :  { %v1810_v8 = vpop.f32.mrf.mxu0 }
0x15bf   :  { %v1811_v19 = vadd.f32 %v4041_v11, %v1810_v8 }
0x15c0   :  { %v2916_v20 = vpop.f32.mrf.mxu0 }
0x15c1   :  { %v1819_v21 = vmul.f32 %v1818_v10, %v1811_v19 }
0x15c2   :  { %v1813_v42 = vpop.f32.mrf.mxu0 }
0x15c3   :  { %v1820_v43 = vsub.f32 %v1817_v5, %v1819_v21 }
0x15c4   :  { %v2917_v31 = vpop.f32.mrf.mxu0 }
0x15c5   :  { %v1824_v34 = vpack.c.bf16 %v1820_v43, %v1820_v43  ;;  %v1955_v22 = vmul.f32 %v1954_v62, %v1820_v43 }
0x15c7   :  { %2935 = vmatmul.mubr.bf16.vlgmr.msra.gmra.mxu1 %v1824_v34 }
0x15c8   :  { %2959 = vmatpush3.bf16.msra.mxu1 %v3873_v55  ;;  %2974 = vmatprep.mubr.msk.bf16.mxu1 %vm3256_vm0, %v3255_v1  ;;  %v2049_v55 = vld [vmem:[#allocation9 + $0x9] ss:$0 sm:$0xff] }
0x15c9   :  { %2960 = vmatprep.subr.bf16.mxu1 %v3255_v1 }
0x15cc   :  { %2961 = vmatpush3.bf16.msra.mxu1 %v3879_v57 }
0x15cd   :  { %2962 = vmatprep.subr.bf16.mxu1 %v3255_v1 }
0x15d0   :  { %2963 = vmatpush3.bf16.msra.mxu1 %v3883_v58 }
0x15d1   :  { %2964 = vmatprep.subr.bf16.mxu1 %v3255_v1 }
0x15d4   :  { %2965 = vmatpush3.bf16.msra.mxu1 %v3887_v59 }
0x15d5   :  { %2966 = vmatprep.subr.bf16.mxu1 %v3255_v1 }
0x15d8   :  { %2967 = vmatpush3.bf16.msra.mxu1 %v3891_v60 }
0x15d9   :  { %2968 = vmatprep.subr.bf16.mxu1 %v3255_v1 }
0x15dc   :  { %2969 = vmatpush3.bf16.msra.mxu1 %v3895_v61 }
0x15dd   :  { %2970 = vmatprep.subr.bf16.mxu1 %v3255_v1 }
0x15e0   :  { %2971 = vmatpush3.bf16.msra.mxu1 %v3987_v13 }
0x15e1   :  { %2972 = vmatprep.subr.bf16.mxu1 %v3255_v1 }
0x15e4   :  { %2973 = vmatpush3.bf16.msra.mxu1 %v3991_v54 }
0x1687   :  { %v1859_v57 = vpop.f32.mrf.mxu1 }
0x1688   :  { %v1860_v58 = vadd.f32 %v1859_v57, %v3493_v56  ;;  %v1956_v56 = vstv %s2048_s10 }
0x1689   :  { %v2936_v59 = vpop.f32.mrf.mxu1 }
0x168a   :  { %v1869_v44 = vadd.f32 %v2049_v55, %v1860_v58 }
0x168b   :  { %v1862_v45 = vpop.f32.mrf.mxu1 }
0x168c   :  { %v1870_v60 = vmax.f32 %v1869_v44, 0.0 }
0x168d   :  { %v2937_v35 = vpop.f32.mrf.mxu1 }
0x168e   :  { %v1871_v36 = vpack.c.bf16 %v1870_v60, %v1870_v60 }
0x1690   :  { %2955 = vmatmul.mubr.bf16.vlgmr.msra.gmra.mxu0 %v1871_v36 }
0x1750   :  { %v1906_v61 = vpop.f32.mrf.mxu0 }
0x1751   :  { %v1907_v37 = vadd.f32 %v4017_v41, %v1906_v61 }
0x1752   :  { %v2956_v38 = vpop.f32.mrf.mxu0 }
0x1753   :  { %v1912_v13 = vmax.f32 %v1907_v37, 0.0 }
0x1754   :  { %v1909_v39 = vpop.f32.mrf.mxu0 }
0x1755   :  { %v1913_v1 = vpack.c.bf16 %v1912_v13, %v1912_v13 }
0x1756   :  { %v2957_v40 = vpop.f32.mrf.mxu0 }
0x1757   :  { %2975 = vmatmul.mubr.bf16.vlgmr.msra.gmra.mxu1 %v1913_v1 }
0x1817   :  { %v1948_v54 = vpop.f32.mrf.mxu1 }
0x1818   :  { %v1949_v63 = vadd.f32 %v4041_v11, %v1948_v54 }
0x1819   :  { %v2976_v0 = vpop.f32.mrf.mxu1 }
0x181a   :  { %v1957_v2 = vmul.f32 %v1956_v56, %v1949_v63 }
0x181b   :  { %v1951_v25 = vpop.f32.mrf.mxu1 }
0x181c   :  { %v1958_v41 = vsub.f32 %v1955_v22, %v1957_v2 }
0x181d   :  { %v2977_v26 = vpop.f32.mrf.mxu1 }
0x181e   :  { %1959 = vst [vmem:[#allocation19] sm:$0x3] %v1958_v41 }
0x181f   :  { %3222 = shalt.err (!%p3219_p2)
}
0x1820   :  { %1969 = dma.vmem_to_hbm [thread:$0]  %s1967_s13, 32, %s4141_s12, [#allocation7]  }
0x1821   :  { %3241 = dma.done.wait [#allocation7], 32  }
0x1822   :  { %3242 = vsyncadd [#allocation7], 4294967264 }
0x1823   :  { %1973 = vsyncpa [#allocation6], 1 }
0x1824   :  { %1974 = vsyncpa [#allocation11], 1 }
0x1825   :  { %1975 = vsyncpa [#allocation14], 1 }
0x1826   :  { %1976 = vsyncpa [#allocation17], 1 }
0x1827   :  { %1977 = vsyncpa [#allocation7], 1 }
0x1828   :  { %1978 = vsyncpa [#allocation8], 1 }

</bundles_post_ra>
